<compile_context>
chip_gen: v5e
topology: v5e:2x2
jax: 0.10.0
libtpu: 0.0.40
codegen_flags: <defaults>
</compile_context>

<pallas_src>
import functools

import jax
import jax.numpy as jnp
from jax.experimental import pallas as pl
from jax.experimental.pallas import tpu as pltpu


def _round_up(x, m):
    return ((x + m - 1) // m) * m


# --------------------------------------------------------------------------
# Kernel
# --------------------------------------------------------------------------
def _mlp_kernel(x_ref, w_in_ref, b_in_ref, w_h_ref, b_h_ref,
                w_out_ref, b_out_ref, out_ref, *, num_layers, compute_dtype):
    """One batch tile through the whole MLP.

    x_ref:   (TB, D)          D = seq_length * input_dim
    w_in:    (D, Hp)   b_in:  (1, Hp)      weights in compute_dtype, biases f32
    w_h:     (L, Hp, Hp) b_h: (L, 1, Hp)
    w_out:   (Hp, D)   b_out: (1, D)
    out:     (TB, D)
    """
    def as_compute(a):
        # Cast only on the reduced-precision path; identity for f32 compute.
        return a if a.dtype == compute_dtype else a.astype(compute_dtype)

    # In-kernel cast of x: free on idle VPU slots, saves a wrapper-side HBM pass.
    x = as_compute(x_ref[...])

    # linear_in -> ReLU (f32 MXU accumulation)
    h = jnp.dot(x, w_in_ref[...], preferred_element_type=jnp.float32)
    h = jnp.maximum(h + b_in_ref[...], 0.0)

    # Hidden layers: per-layer static ref reads keep only one (Hp,Hp) tile live.
    for l in range(num_layers):
        h = jnp.dot(as_compute(h), w_h_ref[l],
                    preferred_element_type=jnp.float32)
        h = jnp.maximum(h + b_h_ref[l], 0.0)

    # Output projection (no final nonlinearity in the reference module).
    y = jnp.dot(as_compute(h), w_out_ref[...],
                preferred_element_type=jnp.float32) + b_out_ref[...]
    out_ref[...] = y.astype(out_ref.dtype)


# --------------------------------------------------------------------------
# Wrapper helpers
# --------------------------------------------------------------------------
def _vmem_capacity_bytes():
    """Physical VMEM of the running part; conservative 64 MiB (v7x) fallback."""
    try:
        return int(pltpu.get_tpu_info().vmem_capacity_bytes)
    except Exception:
        return 64 * 1024 * 1024


def _pick_tile_b(B, max_rows):
    """Batch tile: single step when it fits, else a multiple-of-8 divisor of B
    (no padding, no ragged block); split >=2 tiles for moderately large B so
    both v7x TensorCores get work."""
    max_rows = max(8, (max_rows // 8) * 8)
    if B <= max_rows:
        if B <= 512:
            return B                                   # one grid step
        max_rows = min(max_rows, _round_up(pl.cdiv(B, 2), 8))
    t = (min(max_rows, B) // 8) * 8
    while t >= 8:
        if B % t == 0:
            return t
        t -= 8
    # No clean divisor: rely on Pallas's ragged last block (row-independent
    # math; out-of-range output rows are never materialized).
    return max(8, (min(max_rows, B) // 8) * 8)


def _pad_params(params, hidden_pad, compute_dtype):
    """Zero-pad hidden_dim to hidden_pad (exact: ReLU(0)=0) and pre-cast the
    small resident weights to compute_dtype. Biases stay f32 (added to the
    f32 accumulator)."""
    w_in, b_in, w_h, b_h, w_out, b_out = params
    H = w_in.shape[1]
    dh = hidden_pad - H
    if dh:
        w_in = jnp.pad(w_in, ((0, 0), (0, dh)))
        b_in = jnp.pad(b_in, ((0, 0), (0, dh)))
        w_h = jnp.pad(w_h, ((0, 0), (0, dh), (0, dh)))
        b_h = jnp.pad(b_h, ((0, 0), (0, 0), (0, dh)))
        w_out = jnp.pad(w_out, ((0, dh), (0, 0)))
    return (w_in.astype(compute_dtype), b_in.astype(jnp.float32),
            w_h.astype(compute_dtype), b_h.astype(jnp.float32),
            w_out.astype(compute_dtype), b_out.astype(jnp.float32))


# --------------------------------------------------------------------------
# Forward
# --------------------------------------------------------------------------
def _forward(x, params, *, seq_length, input_dim=4, tile_b=None,
             compute_dtype=jnp.float32, out_dtype=jnp.float32,
             single_buffer_weights=True):
    """x: (B, seq_length, input_dim) -> (B, seq_length, input_dim) in out_dtype."""
    w_in = params[0]
    B = x.shape[0]
    D = seq_length * input_dim
    H = w_in.shape[1]
    L = params[2].shape[0]
    H_pad = max(128, _round_up(H, 8))            # lane-dense hidden activations

    x_flat = x.reshape(B, D)                      # NO wrapper-side dtype cast
    pw_in, pb_in, pw_h, pb_h, pw_out, pb_out = _pad_params(
        params, H_pad, compute_dtype)

    # ---- VMEM budgeting (sized for the actual part: 64 MiB on v7x) ----
    cdt_size = jnp.dtype(compute_dtype).itemsize
    x_size = jnp.dtype(x_flat.dtype).itemsize
    o_size = jnp.dtype(out_dtype).itemsize
    nbuf_w = 1 if single_buffer_weights else 2
    weight_bytes = ((D * H_pad * 2 + L * H_pad * H_pad) * cdt_size
                    + (H_pad * (L + 1) + D) * 4)
    # Double-buffered x/out tiles + slack for intermediate activations.
    per_row_bytes = D * 2 * (x_size + o_size) + H_pad * 16
    vmem_phys = _vmem_capacity_bytes()
    headroom = 2 * 1024 * 1024
    budget = vmem_phys - nbuf_w * weight_bytes - headroom
    max_rows = max(8, min(1024, budget // per_row_bytes))

    if tile_b is None:
        tile_b = _pick_tile_b(B, max_rows)
    tile_b = min(tile_b, B)
    grid = (pl.cdiv(B, tile_b),)

    vmem_limit = int(min(vmem_phys,
                         nbuf_w * weight_bytes + tile_b * per_row_bytes + headroom))
    vmem_limit = max(vmem_limit, 16 * 1024 * 1024)

    # Accurate cost hint for XLA's scheduler (weights resident -> read once).
    flops = 2 * B * (D * H_pad + L * H_pad * H_pad + H_pad * D)
    bytes_accessed = int(x_flat.size * x_size + weight_bytes + B * D * o_size)
    cost = pl.CostEstimate(flops=flops, transcendentals=0,
                           bytes_accessed=bytes_accessed)

    def resident(arr):
        zeros = (0,) * arr.ndim
        idx = lambda i, _z=zeros: _z
        if single_buffer_weights:
            # Grid-invariant: one VMEM copy is enough (default double-buffers).
            return pl.BlockSpec(arr.shape, idx, pipeline_mode=pl.Buffered(1))
        return pl.BlockSpec(arr.shape, idx)

    kernel = functools.partial(_mlp_kernel, num_layers=L,
                               compute_dtype=compute_dtype)

    out_flat = pl.pallas_call(
        kernel,
        out_shape=jax.ShapeDtypeStruct((B, D), out_dtype),
        grid_spec=pltpu.PrefetchScalarGridSpec(
            num_scalar_prefetch=0,
            grid=grid,
            in_specs=[
                pl.BlockSpec((tile_b, D), lambda i: (i, 0)),   # x tile
                resident(pw_in), resident(pb_in),
                resident(pw_h), resident(pb_h),
                resident(pw_out), resident(pb_out),
            ],
            out_specs=pl.BlockSpec((tile_b, D), lambda i: (i, 0)),
        ),
        compiler_params=pltpu.CompilerParams(
            dimension_semantics=("parallel",),
            vmem_limit_bytes=vmem_limit),
        cost_estimate=cost,
    )(x_flat, pw_in, pb_in, pw_h, pb_h, pw_out, pb_out)

    return out_flat.reshape(B, seq_length, input_dim)


mlp_phylo_net_forward = jax.jit(
    _forward,
    static_argnames=("seq_length", "input_dim", "tile_b", "compute_dtype",
                     "out_dtype", "single_buffer_weights"))

_SINGLE_BUFFER_OK = True


def mlp_phylo_net_apply(x, params, **kwargs):
    """Run the Pallas forward. If this JAX build rejects single-buffered
    resident weights (pl.Buffered(1) in pipeline_mode), fall back once to the
    default double-buffered BlockSpecs (identical math)."""
    global _SINGLE_BUFFER_OK
    if _SINGLE_BUFFER_OK:
        try:
            return jax.block_until_ready(
                mlp_phylo_net_forward(x, params, single_buffer_weights=True,
                                      **kwargs))
        except Exception:
            _SINGLE_BUFFER_OK = False
    return jax.block_until_ready(
        mlp_phylo_net_forward(x, params, single_buffer_weights=False, **kwargs))


# --------------------------------------------------------------------------
# Synthetic parameters + pure-JAX reference
# --------------------------------------------------------------------------
def init_params(key, seq_length, hidden_dim, num_layers, input_dim):
    """Deterministic synthetic parameters (shapes match the PyTorch module).
    Note: the module's embed_dim constructor arg is unused by forward()."""
    D = seq_length * input_dim
    ks = jax.random.split(key, 3)

    def lin(k, fan_in, fan_out, extra_shape=()):
        kw, kb = jax.random.split(k)
        bound = 1.0 / jnp.sqrt(fan_in)
        w = jax.random.uniform(kw, extra_shape + (fan_in, fan_out),
                               jnp.float32, -bound, bound)
        b = jax.random.uniform(kb, extra_shape + (1, fan_out),
                               jnp.float32, -bound, bound)
        return w, b

    w_in, b_in = lin(ks[0], D, hidden_dim)                         # linear_in
    w_h, b_h = lin(ks[1], hidden_dim, hidden_dim, (num_layers,))   # hidden_layers
    w_out, b_out = lin(ks[2], hidden_dim, D)                       # out
    return (w_in, b_in, w_h, b_h, w_out, b_out)


def _reference_forward(x, params, seq_length, input_dim,
                       compute_dtype=jnp.float32):
    """Pure-JAX reference mirroring the kernel's dtype handling (unpadded H)."""
    w_in, b_in, w_h, b_h, w_out, b_out = params
    B = x.shape[0]
    xf = x.reshape(B, seq_length * input_dim).astype(compute_dtype)
    h = jnp.dot(xf, w_in.astype(compute_dtype),
                preferred_element_type=jnp.float32) + b_in
    h = jnp.maximum(h, 0.0)
    for l in range(w_h.shape[0]):
        h = jnp.dot(h.astype(compute_dtype), w_h[l].astype(compute_dtype),
                    preferred_element_type=jnp.float32) + b_h[l]
        h = jnp.maximum(h, 0.0)
    y = jnp.dot(h.astype(compute_dtype), w_out.astype(compute_dtype),
                preferred_element_type=jnp.float32) + b_out
    return y.astype(jnp.float32).reshape(B, seq_length, input_dim)


# --------------------------------------------------------------------------
# Demo / self-check
# --------------------------------------------------------------------------
if __name__ == "__main__":
    # Small shapes consistent with the module (D = seq*4 stays a multiple of
    # 128; hidden_dim=4 exercises the lane-padding path).
    SEQ_LENGTH = 128     # module default is 2048; kept small for the demo
    INPUT_DIM = 4
    HIDDEN_DIM = 4
    NUM_LAYERS = 4
    BATCH = 16

    key = jax.random.PRNGKey(0)
    kx, kp = jax.random.split(key)
    x = jax.random.uniform(kx, (BATCH, SEQ_LENGTH, INPUT_DIM), jnp.float32)
    params = init_params(kp, SEQ_LENGTH, HIDDEN_DIM, NUM_LAYERS, INPUT_DIM)

    # 1) f32, whole batch in a single grid step.
    out = mlp_phylo_net_apply(x, params, seq_length=SEQ_LENGTH,
                              input_dim=INPUT_DIM)
    ref = _reference_forward(x, params, SEQ_LENGTH, INPUT_DIM)
    assert out.shape == (BATCH, SEQ_LENGTH, INPUT_DIM)
    assert jnp.allclose(out, ref, atol=1e-5, rtol=1e-5), "f32 mismatch vs reference"

    # 2) Multi-tile grid (forced tile_b divides B: no padding / ragged block).
    x_big = jax.random.uniform(jax.random.PRNGKey(1),
                               (48, SEQ_LENGTH, INPUT_DIM), jnp.float32)
    out_big = mlp_phylo_net_apply(x_big, params, seq_length=SEQ_LENGTH,
                                  input_dim=INPUT_DIM, tile_b=16)
    ref_big = _reference_forward(x_big, params, SEQ_LENGTH, INPUT_DIM)
    assert jnp.allclose(out_big, ref_big, atol=1e-5, rtol=1e-5), \
        "multi-tile f32 mismatch vs reference"

    # 3) bf16 compute + bf16 output (in-kernel x cast, halved writeback).
    out_bf16 = mlp_phylo_net_apply(x, params, seq_length=SEQ_LENGTH,
                                   input_dim=INPUT_DIM,
                                   compute_dtype=jnp.bfloat16,
                                   out_dtype=jnp.bfloat16)
    ref_bf16 = _reference_forward(x, params, SEQ_LENGTH, INPUT_DIM,
                                  compute_dtype=jnp.bfloat16)
    assert out_bf16.dtype == jnp.bfloat16
    assert jnp.allclose(out_bf16.astype(jnp.float32), ref_bf16,
                        atol=2e-2, rtol=2e-2), "bf16 mismatch vs reference"

    print("KERNEL_OK")
</pallas_src>

<mosaic_0001>
module attributes {stable_mosaic.version = 11 : i64} {
  func.func @_mlp_kernel(%arg0: i32, %arg1: memref<16x512xf32, #tpu.memory_space<vmem>>, %arg2: memref<512x128xf32, #tpu.memory_space<vmem>>, %arg3: memref<1x128xf32, #tpu.memory_space<vmem>>, %arg4: memref<4x128x128xf32, #tpu.memory_space<vmem>>, %arg5: memref<4x1x128xf32, #tpu.memory_space<vmem>>, %arg6: memref<128x512xf32, #tpu.memory_space<vmem>>, %arg7: memref<1x512xf32, #tpu.memory_space<vmem>>, %arg8: memref<16x512xf32, #tpu.memory_space<vmem>>) attributes {dimension_semantics = [#tpu.dimension_semantics<parallel>], iteration_bounds = array<i64: 1>, scalar_prefetch = 0 : i64, scratch_operands = 0 : i64, tpu.core_type = #tpu.core_type<tc>, window_params = [{transform_indices = @transform_0, window_bounds = array<i64: 16, 512>}, {pipeline_mode = #tpu.pipeline_mode<synchronous>, transform_indices = @transform_1, window_bounds = array<i64: 512, 128>}, {pipeline_mode = #tpu.pipeline_mode<synchronous>, transform_indices = @transform_2, window_bounds = array<i64: 1, 128>}, {pipeline_mode = #tpu.pipeline_mode<synchronous>, transform_indices = @transform_3, window_bounds = array<i64: 4, 128, 128>}, {pipeline_mode = #tpu.pipeline_mode<synchronous>, transform_indices = @transform_4, window_bounds = array<i64: 4, 1, 128>}, {pipeline_mode = #tpu.pipeline_mode<synchronous>, transform_indices = @transform_5, window_bounds = array<i64: 128, 512>}, {pipeline_mode = #tpu.pipeline_mode<synchronous>, transform_indices = @transform_6, window_bounds = array<i64: 1, 512>}, {transform_indices = @transform_7, window_bounds = array<i64: 16, 512>}]} {
    %c0 = arith.constant 0 : index
    %c0_0 = arith.constant 0 : index
    %0 = vector.load %arg1[%c0, %c0_0] : memref<16x512xf32, #tpu.memory_space<vmem>>, vector<16x512xf32>
    %c0_1 = arith.constant 0 : index
    %c0_2 = arith.constant 0 : index
    %1 = vector.load %arg2[%c0_1, %c0_2] : memref<512x128xf32, #tpu.memory_space<vmem>>, vector<512x128xf32>
    %cst = arith.constant dense<0.000000e+00> : vector<16x128xf32>
    %2 = tpu.matmul %0, %1, %cst {dimension_numbers = #tpu.dot_dimension_numbers<[1], [0], [0], [1], [0, 0, 1, 1], [], []>} : vector<16x512xf32>, vector<512x128xf32>, vector<16x128xf32> -> vector<16x128xf32>
    %c0_3 = arith.constant 0 : index
    %c0_4 = arith.constant 0 : index
    %3 = vector.load %arg3[%c0_3, %c0_4] : memref<1x128xf32, #tpu.memory_space<vmem>>, vector<1x128xf32>
    %4 = vector.broadcast %3 : vector<1x128xf32> to vector<16x128xf32>
    %5 = arith.addf %2, %4 : vector<16x128xf32>
    %cst_5 = arith.constant 0.000000e+00 : f32
    %6 = vector.broadcast %cst_5 : f32 to vector<16x128xf32>
    %7 = arith.maximumf %5, %6 : vector<16x128xf32>
    %c0_6 = arith.constant 0 : index
    %c0_7 = arith.constant 0 : index
    %c0_8 = arith.constant 0 : index
    %8 = vector.load %arg4[%c0_6, %c0_7, %c0_8] : memref<4x128x128xf32, #tpu.memory_space<vmem>>, vector<1x128x128xf32>
    %9 = vector.shape_cast %8 : vector<1x128x128xf32> to vector<128x128xf32>
    %cst_9 = arith.constant dense<0.000000e+00> : vector<16x128xf32>
    %10 = tpu.matmul %7, %9, %cst_9 {dimension_numbers = #tpu.dot_dimension_numbers<[1], [0], [0], [1], [0, 0, 1, 1], [], []>} : vector<16x128xf32>, vector<128x128xf32>, vector<16x128xf32> -> vector<16x128xf32>
    %c0_10 = arith.constant 0 : index
    %c0_11 = arith.constant 0 : index
    %c0_12 = arith.constant 0 : index
    %11 = vector.load %arg5[%c0_10, %c0_11, %c0_12] : memref<4x1x128xf32, #tpu.memory_space<vmem>>, vector<1x1x128xf32>
    %12 = vector.shape_cast %11 : vector<1x1x128xf32> to vector<1x128xf32>
    %13 = vector.broadcast %12 : vector<1x128xf32> to vector<16x128xf32>
    %14 = arith.addf %10, %13 : vector<16x128xf32>
    %cst_13 = arith.constant 0.000000e+00 : f32
    %15 = vector.broadcast %cst_13 : f32 to vector<16x128xf32>
    %16 = arith.maximumf %14, %15 : vector<16x128xf32>
    %c1 = arith.constant 1 : index
    %c0_14 = arith.constant 0 : index
    %c0_15 = arith.constant 0 : index
    %17 = vector.load %arg4[%c1, %c0_14, %c0_15] : memref<4x128x128xf32, #tpu.memory_space<vmem>>, vector<1x128x128xf32>
    %18 = vector.shape_cast %17 : vector<1x128x128xf32> to vector<128x128xf32>
    %cst_16 = arith.constant dense<0.000000e+00> : vector<16x128xf32>
    %19 = tpu.matmul %16, %18, %cst_16 {dimension_numbers = #tpu.dot_dimension_numbers<[1], [0], [0], [1], [0, 0, 1, 1], [], []>} : vector<16x128xf32>, vector<128x128xf32>, vector<16x128xf32> -> vector<16x128xf32>
    %c1_17 = arith.constant 1 : index
    %c0_18 = arith.constant 0 : index
    %c0_19 = arith.constant 0 : index
    %20 = vector.load %arg5[%c1_17, %c0_18, %c0_19] : memref<4x1x128xf32, #tpu.memory_space<vmem>>, vector<1x1x128xf32>
    %21 = vector.shape_cast %20 : vector<1x1x128xf32> to vector<1x128xf32>
    %22 = vector.broadcast %21 : vector<1x128xf32> to vector<16x128xf32>
    %23 = arith.addf %19, %22 : vector<16x128xf32>
    %cst_20 = arith.constant 0.000000e+00 : f32
    %24 = vector.broadcast %cst_20 : f32 to vector<16x128xf32>
    %25 = arith.maximumf %23, %24 : vector<16x128xf32>
    %c2 = arith.constant 2 : index
    %c0_21 = arith.constant 0 : index
    %c0_22 = arith.constant 0 : index
    %26 = vector.load %arg4[%c2, %c0_21, %c0_22] : memref<4x128x128xf32, #tpu.memory_space<vmem>>, vector<1x128x128xf32>
    %27 = vector.shape_cast %26 : vector<1x128x128xf32> to vector<128x128xf32>
    %cst_23 = arith.constant dense<0.000000e+00> : vector<16x128xf32>
    %28 = tpu.matmul %25, %27, %cst_23 {dimension_numbers = #tpu.dot_dimension_numbers<[1], [0], [0], [1], [0, 0, 1, 1], [], []>} : vector<16x128xf32>, vector<128x128xf32>, vector<16x128xf32> -> vector<16x128xf32>
    %c2_24 = arith.constant 2 : index
    %c0_25 = arith.constant 0 : index
    %c0_26 = arith.constant 0 : index
    %29 = vector.load %arg5[%c2_24, %c0_25, %c0_26] : memref<4x1x128xf32, #tpu.memory_space<vmem>>, vector<1x1x128xf32>
    %30 = vector.shape_cast %29 : vector<1x1x128xf32> to vector<1x128xf32>
    %31 = vector.broadcast %30 : vector<1x128xf32> to vector<16x128xf32>
    %32 = arith.addf %28, %31 : vector<16x128xf32>
    %cst_27 = arith.constant 0.000000e+00 : f32
    %33 = vector.broadcast %cst_27 : f32 to vector<16x128xf32>
    %34 = arith.maximumf %32, %33 : vector<16x128xf32>
    %c3 = arith.constant 3 : index
    %c0_28 = arith.constant 0 : index
    %c0_29 = arith.constant 0 : index
    %35 = vector.load %arg4[%c3, %c0_28, %c0_29] : memref<4x128x128xf32, #tpu.memory_space<vmem>>, vector<1x128x128xf32>
    %36 = vector.shape_cast %35 : vector<1x128x128xf32> to vector<128x128xf32>
    %cst_30 = arith.constant dense<0.000000e+00> : vector<16x128xf32>
    %37 = tpu.matmul %34, %36, %cst_30 {dimension_numbers = #tpu.dot_dimension_numbers<[1], [0], [0], [1], [0, 0, 1, 1], [], []>} : vector<16x128xf32>, vector<128x128xf32>, vector<16x128xf32> -> vector<16x128xf32>
    %c3_31 = arith.constant 3 : index
    %c0_32 = arith.constant 0 : index
    %c0_33 = arith.constant 0 : index
    %38 = vector.load %arg5[%c3_31, %c0_32, %c0_33] : memref<4x1x128xf32, #tpu.memory_space<vmem>>, vector<1x1x128xf32>
    %39 = vector.shape_cast %38 : vector<1x1x128xf32> to vector<1x128xf32>
    %40 = vector.broadcast %39 : vector<1x128xf32> to vector<16x128xf32>
    %41 = arith.addf %37, %40 : vector<16x128xf32>
    %cst_34 = arith.constant 0.000000e+00 : f32
    %42 = vector.broadcast %cst_34 : f32 to vector<16x128xf32>
    %43 = arith.maximumf %41, %42 : vector<16x128xf32>
    %c0_35 = arith.constant 0 : index
    %c0_36 = arith.constant 0 : index
    %44 = vector.load %arg6[%c0_35, %c0_36] : memref<128x512xf32, #tpu.memory_space<vmem>>, vector<128x512xf32>
    %cst_37 = arith.constant dense<0.000000e+00> : vector<16x512xf32>
    %45 = tpu.matmul %43, %44, %cst_37 {dimension_numbers = #tpu.dot_dimension_numbers<[1], [0], [0], [1], [0, 0, 1, 1], [], []>} : vector<16x128xf32>, vector<128x512xf32>, vector<16x512xf32> -> vector<16x512xf32>
    %c0_38 = arith.constant 0 : index
    %c0_39 = arith.constant 0 : index
    %46 = vector.load %arg7[%c0_38, %c0_39] : memref<1x512xf32, #tpu.memory_space<vmem>>, vector<1x512xf32>
    %47 = vector.broadcast %46 : vector<1x512xf32> to vector<16x512xf32>
    %48 = arith.addf %45, %47 : vector<16x512xf32>
    %c0_40 = arith.constant 0 : index
    %c0_41 = arith.constant 0 : index
    %49 = vector.load %arg8[%c0_40, %c0_41] : memref<16x512xf32, #tpu.memory_space<vmem>>, vector<16x512xf32>
    tpu.vector_store %arg8[%c0_40, %c0_41], %48 {strides = array<i32>} : memref<16x512xf32, #tpu.memory_space<vmem>>, vector<16x512xf32>,
    return
  }
  func.func @transform_0(%arg0: i32) -> (i32, i32) {
    %c0_i32 = arith.constant 0 : i32
    %c0_i32_0 = arith.constant 0 : i32
    return %arg0, %c0_i32 : i32, i32
  }
  func.func @transform_1(%arg0: i32) -> (i32, i32) {
    %c0_i32 = arith.constant 0 : i32
    %c0_i32_0 = arith.constant 0 : i32
    %c0_i32_1 = arith.constant 0 : i32
    return %c0_i32, %c0_i32_0 : i32, i32
  }
  func.func @transform_2(%arg0: i32) -> (i32, i32) {
    %c0_i32 = arith.constant 0 : i32
    %c0_i32_0 = arith.constant 0 : i32
    %c0_i32_1 = arith.constant 0 : i32
    return %c0_i32, %c0_i32_0 : i32, i32
  }
  func.func @transform_3(%arg0: i32) -> (i32, i32, i32) {
    %c0_i32 = arith.constant 0 : i32
    %c0_i32_0 = arith.constant 0 : i32
    %c0_i32_1 = arith.constant 0 : i32
    %c0_i32_2 = arith.constant 0 : i32
    return %c0_i32, %c0_i32_0, %c0_i32_1 : i32, i32, i32
  }
  func.func @transform_4(%arg0: i32) -> (i32, i32, i32) {
    %c0_i32 = arith.constant 0 : i32
    %c0_i32_0 = arith.constant 0 : i32
    %c0_i32_1 = arith.constant 0 : i32
    %c0_i32_2 = arith.constant 0 : i32
    return %c0_i32, %c0_i32_0, %c0_i32_1 : i32, i32, i32
  }
  func.func @transform_5(%arg0: i32) -> (i32, i32) {
    %c0_i32 = arith.constant 0 : i32
    %c0_i32_0 = arith.constant 0 : i32
    %c0_i32_1 = arith.constant 0 : i32
    return %c0_i32, %c0_i32_0 : i32, i32
  }
  func.func @transform_6(%arg0: i32) -> (i32, i32) {
    %c0_i32 = arith.constant 0 : i32
    %c0_i32_0 = arith.constant 0 : i32
    %c0_i32_1 = arith.constant 0 : i32
    return %c0_i32, %c0_i32_0 : i32, i32
  }
  func.func @transform_7(%arg0: i32) -> (i32, i32) {
    %c0_i32 = arith.constant 0 : i32
    %c0_i32_0 = arith.constant 0 : i32
    return %arg0, %c0_i32 : i32, i32
  }
}

module attributes {stable_mosaic.version = 11 : i64} {
  func.func @_mlp_kernel(%arg0: i32, %arg1: memref<16x512xf32, #tpu.memory_space<vmem>>, %arg2: memref<512x128xf32, #tpu.memory_space<vmem>>, %arg3: memref<1x128xf32, #tpu.memory_space<vmem>>, %arg4: memref<4x128x128xf32, #tpu.memory_space<vmem>>, %arg5: memref<4x1x128xf32, #tpu.memory_space<vmem>>, %arg6: memref<128x512xf32, #tpu.memory_space<vmem>>, %arg7: memref<1x512xf32, #tpu.memory_space<vmem>>, %arg8: memref<16x512xf32, #tpu.memory_space<vmem>>) attributes {dimension_semantics = [#tpu.dimension_semantics<parallel>], iteration_bounds = array<i64: 1>, scalar_prefetch = 0 : i64, scratch_operands = 0 : i64, tpu.core_type = #tpu.core_type<tc>, window_params = [{transform_indices = @transform_0, window_bounds = array<i64: 16, 512>}, {pipeline_mode = #tpu.pipeline_mode<synchronous>, transform_indices = @transform_1, window_bounds = array<i64: 512, 128>}, {pipeline_mode = #tpu.pipeline_mode<synchronous>, transform_indices = @transform_2, window_bounds = array<i64: 1, 128>}, {pipeline_mode = #tpu.pipeline_mode<synchronous>, transform_indices = @transform_3, window_bounds = array<i64: 4, 128, 128>}, {pipeline_mode = #tpu.pipeline_mode<synchronous>, transform_indices = @transform_4, window_bounds = array<i64: 4, 1, 128>}, {pipeline_mode = #tpu.pipeline_mode<synchronous>, transform_indices = @transform_5, window_bounds = array<i64: 128, 512>}, {pipeline_mode = #tpu.pipeline_mode<synchronous>, transform_indices = @transform_6, window_bounds = array<i64: 1, 512>}, {transform_indices = @transform_7, window_bounds = array<i64: 16, 512>}]} {
    %c0 = arith.constant 0 : index
    %c0_0 = arith.constant 0 : index
    %0 = vector.load %arg1[%c0, %c0_0] : memref<16x512xf32, #tpu.memory_space<vmem>>, vector<16x512xf32>
    %c0_1 = arith.constant 0 : index
    %c0_2 = arith.constant 0 : index
    %1 = vector.load %arg2[%c0_1, %c0_2] : memref<512x128xf32, #tpu.memory_space<vmem>>, vector<512x128xf32>
    %cst = arith.constant dense<0.000000e+00> : vector<16x128xf32>
    %2 = tpu.matmul %0, %1, %cst {dimension_numbers = #tpu.dot_dimension_numbers<[1], [0], [0], [1], [0, 0, 1, 1], [], []>} : vector<16x512xf32>, vector<512x128xf32>, vector<16x128xf32> -> vector<16x128xf32>
    %c0_3 = arith.constant 0 : index
    %c0_4 = arith.constant 0 : index
    %3 = vector.load %arg3[%c0_3, %c0_4] : memref<1x128xf32, #tpu.memory_space<vmem>>, vector<1x128xf32>
    %4 = vector.broadcast %3 : vector<1x128xf32> to vector<16x128xf32>
    %5 = arith.addf %2, %4 : vector<16x128xf32>
    %cst_5 = arith.constant 0.000000e+00 : f32
    %6 = vector.broadcast %cst_5 : f32 to vector<16x128xf32>
    %7 = arith.maximumf %5, %6 : vector<16x128xf32>
    %c0_6 = arith.constant 0 : index
    %c0_7 = arith.constant 0 : index
    %c0_8 = arith.constant 0 : index
    %8 = vector.load %arg4[%c0_6, %c0_7, %c0_8] : memref<4x128x128xf32, #tpu.memory_space<vmem>>, vector<1x128x128xf32>
    %9 = vector.shape_cast %8 : vector<1x128x128xf32> to vector<128x128xf32>
    %cst_9 = arith.constant dense<0.000000e+00> : vector<16x128xf32>
    %10 = tpu.matmul %7, %9, %cst_9 {dimension_numbers = #tpu.dot_dimension_numbers<[1], [0], [0], [1], [0, 0, 1, 1], [], []>} : vector<16x128xf32>, vector<128x128xf32>, vector<16x128xf32> -> vector<16x128xf32>
    %c0_10 = arith.constant 0 : index
    %c0_11 = arith.constant 0 : index
    %c0_12 = arith.constant 0 : index
    %11 = vector.load %arg5[%c0_10, %c0_11, %c0_12] : memref<4x1x128xf32, #tpu.memory_space<vmem>>, vector<1x1x128xf32>
    %12 = vector.shape_cast %11 : vector<1x1x128xf32> to vector<1x128xf32>
    %13 = vector.broadcast %12 : vector<1x128xf32> to vector<16x128xf32>
    %14 = arith.addf %10, %13 : vector<16x128xf32>
    %cst_13 = arith.constant 0.000000e+00 : f32
    %15 = vector.broadcast %cst_13 : f32 to vector<16x128xf32>
    %16 = arith.maximumf %14, %15 : vector<16x128xf32>
    %c1 = arith.constant 1 : index
    %c0_14 = arith.constant 0 : index
    %c0_15 = arith.constant 0 : index
    %17 = vector.load %arg4[%c1, %c0_14, %c0_15] : memref<4x128x128xf32, #tpu.memory_space<vmem>>, vector<1x128x128xf32>
    %18 = vector.shape_cast %17 : vector<1x128x128xf32> to vector<128x128xf32>
    %cst_16 = arith.constant dense<0.000000e+00> : vector<16x128xf32>
    %19 = tpu.matmul %16, %18, %cst_16 {dimension_numbers = #tpu.dot_dimension_numbers<[1], [0], [0], [1], [0, 0, 1, 1], [], []>} : vector<16x128xf32>, vector<128x128xf32>, vector<16x128xf32> -> vector<16x128xf32>
    %c1_17 = arith.constant 1 : index
    %c0_18 = arith.constant 0 : index
    %c0_19 = arith.constant 0 : index
    %20 = vector.load %arg5[%c1_17, %c0_18, %c0_19] : memref<4x1x128xf32, #tpu.memory_space<vmem>>, vector<1x1x128xf32>
    %21 = vector.shape_cast %20 : vector<1x1x128xf32> to vector<1x128xf32>
    %22 = vector.broadcast %21 : vector<1x128xf32> to vector<16x128xf32>
    %23 = arith.addf %19, %22 : vector<16x128xf32>
    %cst_20 = arith.constant 0.000000e+00 : f32
    %24 = vector.broadcast %cst_20 : f32 to vector<16x128xf32>
    %25 = arith.maximumf %23, %24 : vector<16x128xf32>
    %c2 = arith.constant 2 : index
    %c0_21 = arith.constant 0 : index
    %c0_22 = arith.constant 0 : index
    %26 = vector.load %arg4[%c2, %c0_21, %c0_22] : memref<4x128x128xf32, #tpu.memory_space<vmem>>, vector<1x128x128xf32>
    %27 = vector.shape_cast %26 : vector<1x128x128xf32> to vector<128x128xf32>
    %cst_23 = arith.constant dense<0.000000e+00> : vector<16x128xf32>
    %28 = tpu.matmul %25, %27, %cst_23 {dimension_numbers = #tpu.dot_dimension_numbers<[1], [0], [0], [1], [0, 0, 1, 1], [], []>} : vector<16x128xf32>, vector<128x128xf32>, vector<16x128xf32> -> vector<16x128xf32>
    %c2_24 = arith.constant 2 : index
    %c0_25 = arith.constant 0 : index
    %c0_26 = arith.constant 0 : index
    %29 = vector.load %arg5[%c2_24, %c0_25, %c0_26] : memref<4x1x128xf32, #tpu.memory_space<vmem>>, vector<1x1x128xf32>
    %30 = vector.shape_cast %29 : vector<1x1x128xf32> to vector<1x128xf32>
    %31 = vector.broadcast %30 : vector<1x128xf32> to vector<16x128xf32>
    %32 = arith.addf %28, %31 : vector<16x128xf32>
    %cst_27 = arith.constant 0.000000e+00 : f32
    %33 = vector.broadcast %cst_27 : f32 to vector<16x128xf32>
    %34 = arith.maximumf %32, %33 : vector<16x128xf32>
    %c3 = arith.constant 3 : index
    %c0_28 = arith.constant 0 : index
    %c0_29 = arith.constant 0 : index
    %35 = vector.load %arg4[%c3, %c0_28, %c0_29] : memref<4x128x128xf32, #tpu.memory_space<vmem>>, vector<1x128x128xf32>
    %36 = vector.shape_cast %35 : vector<1x128x128xf32> to vector<128x128xf32>
    %cst_30 = arith.constant dense<0.000000e+00> : vector<16x128xf32>
    %37 = tpu.matmul %34, %36, %cst_30 {dimension_numbers = #tpu.dot_dimension_numbers<[1], [0], [0], [1], [0, 0, 1, 1], [], []>} : vector<16x128xf32>, vector<128x128xf32>, vector<16x128xf32> -> vector<16x128xf32>
    %c3_31 = arith.constant 3 : index
    %c0_32 = arith.constant 0 : index
    %c0_33 = arith.constant 0 : index
    %38 = vector.load %arg5[%c3_31, %c0_32, %c0_33] : memref<4x1x128xf32, #tpu.memory_space<vmem>>, vector<1x1x128xf32>
    %39 = vector.shape_cast %38 : vector<1x1x128xf32> to vector<1x128xf32>
    %40 = vector.broadcast %39 : vector<1x128xf32> to vector<16x128xf32>
    %41 = arith.addf %37, %40 : vector<16x128xf32>
    %cst_34 = arith.constant 0.000000e+00 : f32
    %42 = vector.broadcast %cst_34 : f32 to vector<16x128xf32>
    %43 = arith.maximumf %41, %42 : vector<16x128xf32>
    %c0_35 = arith.constant 0 : index
    %c0_36 = arith.constant 0 : index
    %44 = vector.load %arg6[%c0_35, %c0_36] : memref<128x512xf32, #tpu.memory_space<vmem>>, vector<128x512xf32>
    %cst_37 = arith.constant dense<0.000000e+00> : vector<16x512xf32>
    %45 = tpu.matmul %43, %44, %cst_37 {dimension_numbers = #tpu.dot_dimension_numbers<[1], [0], [0], [1], [0, 0, 1, 1], [], []>} : vector<16x128xf32>, vector<128x512xf32>, vector<16x512xf32> -> vector<16x512xf32>
    %c0_38 = arith.constant 0 : index
    %c0_39 = arith.constant 0 : index
    %46 = vector.load %arg7[%c0_38, %c0_39] : memref<1x512xf32, #tpu.memory_space<vmem>>, vector<1x512xf32>
    %47 = vector.broadcast %46 : vector<1x512xf32> to vector<16x512xf32>
    %48 = arith.addf %45, %47 : vector<16x512xf32>
    %c0_40 = arith.constant 0 : index
    %c0_41 = arith.constant 0 : index
    %49 = vector.load %arg8[%c0_40, %c0_41] : memref<16x512xf32, #tpu.memory_space<vmem>>, vector<16x512xf32>
    tpu.vector_store %arg8[%c0_40, %c0_41], %48 {strides = array<i32>} : memref<16x512xf32, #tpu.memory_space<vmem>>, vector<16x512xf32>,
    return
  }
  func.func @transform_0(%arg0: i32) -> (i32, i32) {
    %c0_i32 = arith.constant 0 : i32
    %c0_i32_0 = arith.constant 0 : i32
    return %arg0, %c0_i32 : i32, i32
  }
  func.func @transform_1(%arg0: i32) -> (i32, i32) {
    %c0_i32 = arith.constant 0 : i32
    %c0_i32_0 = arith.constant 0 : i32
    %c0_i32_1 = arith.constant 0 : i32
    return %c0_i32, %c0_i32_0 : i32, i32
  }
  func.func @transform_2(%arg0: i32) -> (i32, i32) {
    %c0_i32 = arith.constant 0 : i32
    %c0_i32_0 = arith.constant 0 : i32
    %c0_i32_1 = arith.constant 0 : i32
    return %c0_i32, %c0_i32_0 : i32, i32
  }
  func.func @transform_3(%arg0: i32) -> (i32, i32, i32) {
    %c0_i32 = arith.constant 0 : i32
    %c0_i32_0 = arith.constant 0 : i32
    %c0_i32_1 = arith.constant 0 : i32
    %c0_i32_2 = arith.constant 0 : i32
    return %c0_i32, %c0_i32_0, %c0_i32_1 : i32, i32, i32
  }
  func.func @transform_4(%arg0: i32) -> (i32, i32, i32) {
    %c0_i32 = arith.constant 0 : i32
    %c0_i32_0 = arith.constant 0 : i32
    %c0_i32_1 = arith.constant 0 : i32
    %c0_i32_2 = arith.constant 0 : i32
    return %c0_i32, %c0_i32_0, %c0_i32_1 : i32, i32, i32
  }
  func.func @transform_5(%arg0: i32) -> (i32, i32) {
    %c0_i32 = arith.constant 0 : i32
    %c0_i32_0 = arith.constant 0 : i32
    %c0_i32_1 = arith.constant 0 : i32
    return %c0_i32, %c0_i32_0 : i32, i32
  }
  func.func @transform_6(%arg0: i32) -> (i32, i32) {
    %c0_i32 = arith.constant 0 : i32
    %c0_i32_0 = arith.constant 0 : i32
    %c0_i32_1 = arith.constant 0 : i32
    return %c0_i32, %c0_i32_0 : i32, i32
  }
  func.func @transform_7(%arg0: i32) -> (i32, i32) {
    %c0_i32 = arith.constant 0 : i32
    %c0_i32_0 = arith.constant 0 : i32
    return %arg0, %c0_i32 : i32, i32
  }
}

</mosaic_0001>

<bundles_post_ra>
// kernel: _forward.1
= control target key start
LH: loop header
LB: loop body
LE: loop exit
PB: predicated region body
PF: predicated region fallthrough
CT: control target
= control target key end

     0   :  { %s1298_s1 = inlined_call_operand.vmem [shape: f32[512,128], index: 1, kind: input, shape index: {}]   ;;  %s1299_s0 = inlined_call_operand.vmem [shape: f32[16,512], index: 0, kind: input, shape index: {}]   ;;  %s1300_s2 = inlined_call_operand.vmem [shape: f32[1,128], index: 2, kind: input, shape index: {}]   ;;  %s1301_s3 = inlined_call_operand.vmem [shape: f32[4,128,128], index: 3, kind: input, shape index: {}]   ;;  %s1302_s4 = inlined_call_operand.vmem [shape: f32[4,1,128], index: 4, kind: input, shape index: {}]   ;;  %s1303_s5 = inlined_call_operand.vmem [shape: f32[128,512], index: 5, kind: input, shape index: {}]   ;;  %s1304_s6 = inlined_call_operand.vmem [shape: f32[1,512], index: 6, kind: input, shape index: {}]   ;;  %s1305_s7 = inlined_call_operand.vmem [shape: f32[16,512], index: 7, kind: output, shape index: {}]  }
   0x1   :  { %v81_v0 = vld [vmem:[%s1298_s1 + $0x178] sm:$0xff]  ;;  %v80_v2 = vld [vmem:[%s1298_s1 + $0x170] sm:$0xff]  ;;  %v79_v6 = vld [vmem:[%s1298_s1 + $0x168] sm:$0xff] }
   0x2   :  { %v49_v1 = vld [vmem:[%s1298_s1 + $0x78] sm:$0xff]  ;;  %148 = vmatpush.msra.mxu2 %v81_v0  ;;  %v48_v4 = vld [vmem:[%s1298_s1 + $0x70] sm:$0xff]  ;;  %v47_v8 = vld [vmem:[%s1298_s1 + $0x68] sm:$0xff] }
   0x3   :  { %102 = vmatpush.msra.mxu0 %v49_v1  ;;  %v97_v3 = vld [vmem:[%s1298_s1 + $0x1f8] sm:$0xff]  ;;  %v96_v7 = vld [vmem:[%s1298_s1 + $0x1f0] sm:$0xff]  ;;  %v95_v10 = vld [vmem:[%s1298_s1 + $0x1e8] sm:$0xff] }
   0x4   :  { %v65_v5 = vld [vmem:[%s1298_s1 + $0xf8] sm:$0xff]  ;;  %171 = vmatpush.msra.mxu3 %v97_v3  ;;  %149 = vmatpush.msra.mxu2 %v80_v2  ;;  %v64_v9 = vld [vmem:[%s1298_s1 + $0xf0] sm:$0xff]  ;;  %v78_v11 = vld [vmem:[%s1298_s1 + $0x160] sm:$0xff] }
   0x5   :  { %125 = vmatpush.msra.mxu1 %v65_v5  ;;  %103 = vmatpush.msra.mxu0 %v48_v4  ;;  %v46_v12 = vld [vmem:[%s1298_s1 + $0x60] sm:$0xff]  ;;  %v63_v13 = vld [vmem:[%s1298_s1 + $0xe8] sm:$0xff]  ;;  %v77_v16 = vld [vmem:[%s1298_s1 + $0x158] sm:$0xff] }
   0x6   :  { %172 = vmatpush.msra.mxu3 %v96_v7  ;;  %150 = vmatpush.msra.mxu2 %v79_v6  ;;  %v94_v14 = vld [vmem:[%s1298_s1 + $0x1e0] sm:$0xff]  ;;  %v45_v17 = vld [vmem:[%s1298_s1 + $0x58] sm:$0xff]  ;;  %v76_v20 = vld [vmem:[%s1298_s1 + $0x150] sm:$0xff] }
   0x7   :  { %126 = vmatpush.msra.mxu1 %v64_v9  ;;  %104 = vmatpush.msra.mxu0 %v47_v8  ;;  %v62_v15 = vld [vmem:[%s1298_s1 + $0xe0] sm:$0xff]  ;;  %v93_v18 = vld [vmem:[%s1298_s1 + $0x1d8] sm:$0xff]  ;;  %v44_v21 = vld [vmem:[%s1298_s1 + $0x50] sm:$0xff] }
   0x8   :  { %173 = vmatpush.msra.mxu3 %v95_v10  ;;  %151 = vmatpush.msra.mxu2 %v78_v11  ;;  %v61_v19 = vld [vmem:[%s1298_s1 + $0xd8] sm:$0xff]  ;;  %v92_v22 = vld [vmem:[%s1298_s1 + $0x1d0] sm:$0xff]  ;;  %v75_v24 = vld [vmem:[%s1298_s1 + $0x148] sm:$0xff] }
   0x9   :  { %127 = vmatpush.msra.mxu1 %v63_v13  ;;  %105 = vmatpush.msra.mxu0 %v46_v12  ;;  %v60_v23 = vld [vmem:[%s1298_s1 + $0xd0] sm:$0xff]  ;;  %v43_v25 = vld [vmem:[%s1298_s1 + $0x48] sm:$0xff]  ;;  %v74_v28 = vld [vmem:[%s1298_s1 + $0x140] sm:$0xff] }
   0xa   :  { %174 = vmatpush.msra.mxu3 %v94_v14  ;;  %152 = vmatpush.msra.mxu2 %v77_v16  ;;  %v91_v26 = vld [vmem:[%s1298_s1 + $0x1c8] sm:$0xff]  ;;  %v42_v29 = vld [vmem:[%s1298_s1 + $0x40] sm:$0xff]  ;;  %v73_v32 = vld [vmem:[%s1298_s1 + $0x138] sm:$0xff] }
   0xb   :  { %128 = vmatpush.msra.mxu1 %v62_v15  ;;  %106 = vmatpush.msra.mxu0 %v45_v17  ;;  %v59_v27 = vld [vmem:[%s1298_s1 + $0xc8] sm:$0xff]  ;;  %v90_v30 = vld [vmem:[%s1298_s1 + $0x1c0] sm:$0xff]  ;;  %v41_v33 = vld [vmem:[%s1298_s1 + $0x38] sm:$0xff] }
   0xc   :  { %175 = vmatpush.msra.mxu3 %v93_v18  ;;  %153 = vmatpush.msra.mxu2 %v76_v20  ;;  %v58_v31 = vld [vmem:[%s1298_s1 + $0xc0] sm:$0xff]  ;;  %v89_v34 = vld [vmem:[%s1298_s1 + $0x1b8] sm:$0xff]  ;;  %v72_v36 = vld [vmem:[%s1298_s1 + $0x130] sm:$0xff] }
   0xd   :  { %129 = vmatpush.msra.mxu1 %v61_v19  ;;  %107 = vmatpush.msra.mxu0 %v44_v21  ;;  %v57_v35 = vld [vmem:[%s1298_s1 + $0xb8] sm:$0xff]  ;;  %v40_v37 = vld [vmem:[%s1298_s1 + $0x30] sm:$0xff]  ;;  %v71_v40 = vld [vmem:[%s1298_s1 + $0x128] sm:$0xff] }
   0xe   :  { %176 = vmatpush.msra.mxu3 %v92_v22  ;;  %154 = vmatpush.msra.mxu2 %v75_v24  ;;  %v88_v38 = vld [vmem:[%s1298_s1 + $0x1b0] sm:$0xff]  ;;  %v39_v41 = vld [vmem:[%s1298_s1 + $0x28] sm:$0xff]  ;;  %v70_v44 = vld [vmem:[%s1298_s1 + $0x120] sm:$0xff] }
   0xf   :  { %130 = vmatpush.msra.mxu1 %v60_v23  ;;  %108 = vmatpush.msra.mxu0 %v43_v25  ;;  %v56_v39 = vld [vmem:[%s1298_s1 + $0xb0] sm:$0xff]  ;;  %v87_v42 = vld [vmem:[%s1298_s1 + $0x1a8] sm:$0xff]  ;;  %v38_v45 = vld [vmem:[%s1298_s1 + $0x20] sm:$0xff] }
  0x10   :  { %177 = vmatpush.msra.mxu3 %v91_v26  ;;  %155 = vmatpush.msra.mxu2 %v74_v28  ;;  %v55_v43 = vld [vmem:[%s1298_s1 + $0xa8] sm:$0xff]  ;;  %v86_v46 = vld [vmem:[%s1298_s1 + $0x1a0] sm:$0xff]  ;;  %v69_v48 = vld [vmem:[%s1298_s1 + $0x118] sm:$0xff] }
  0x11   :  { %131 = vmatpush.msra.mxu1 %v59_v27  ;;  %109 = vmatpush.msra.mxu0 %v42_v29  ;;  %v54_v47 = vld [vmem:[%s1298_s1 + $0xa0] sm:$0xff]  ;;  %v37_v49 = vld [vmem:[%s1298_s1 + $0x18] sm:$0xff]  ;;  %v68_v52 = vld [vmem:[%s1298_s1 + $0x110] sm:$0xff] }
  0x12   :  { %178 = vmatpush.msra.mxu3 %v90_v30  ;;  %156 = vmatpush.msra.mxu2 %v73_v32  ;;  %v85_v50 = vld [vmem:[%s1298_s1 + $0x198] sm:$0xff]  ;;  %v36_v53 = vld [vmem:[%s1298_s1 + $0x10] sm:$0xff]  ;;  %v67_v56 = vld [vmem:[%s1298_s1 + $0x108] sm:$0xff] }
  0x13   :  { %132 = vmatpush.msra.mxu1 %v58_v31  ;;  %110 = vmatpush.msra.mxu0 %v41_v33  ;;  %v53_v51 = vld [vmem:[%s1298_s1 + $0x98] sm:$0xff]  ;;  %v84_v54 = vld [vmem:[%s1298_s1 + $0x190] sm:$0xff]  ;;  %v35_v57 = vld [vmem:[%s1298_s1 + $0x8] sm:$0xff] }
  0x14   :  { %179 = vmatpush.msra.mxu3 %v89_v34  ;;  %157 = vmatpush.msra.mxu2 %v72_v36  ;;  %v52_v55 = vld [vmem:[%s1298_s1 + $0x90] sm:$0xff]  ;;  %v83_v58 = vld [vmem:[%s1298_s1 + $0x188] sm:$0xff]  ;;  %v66_v60 = vld [vmem:[%s1298_s1 + $0x100] sm:$0xff] }
  0x15   :  { %133 = vmatpush.msra.mxu1 %v57_v35  ;;  %111 = vmatpush.msra.mxu0 %v40_v37  ;;  %v51_v59 = vld [vmem:[%s1298_s1 + $0x88] sm:$0xff]  ;;  %v34_v61 = vld [vmem:[%s1298_s1] sm:$0xff]  ;;  %v28_v62 = vld [vmem:[%s1299_s0 + $0x10] sm:$0xff] }
  0x16   :  { %180 = vmatpush.msra.mxu3 %v88_v38  ;;  %158 = vmatpush.msra.mxu2 %v71_v40  ;;  %v82_v63 = vld [vmem:[%s1298_s1 + $0x180] sm:$0xff]  ;;  %v29_v1 = vld [vmem:[%s1299_s0 + $0x18] sm:$0xff]  ;;  %v27_v4 = vld [vmem:[%s1299_s0 + $0x8] sm:$0xff] }
  0x17   :  { %134 = vmatpush.msra.mxu1 %v56_v39  ;;  %112 = vmatpush.msra.mxu0 %v39_v41  ;;  %v26_v0 = vld [vmem:[%s1299_s0] sm:$0xff]  ;;  %v211_v3 = vld [vmem:[%s1301_s3 + $0x78] sm:$0xff]  ;;  %v210_v5 = vld [vmem:[%s1301_s3 + $0x70] sm:$0xff] }
  0x18   :  { %181 = vmatpush.msra.mxu3 %v87_v42  ;;  %159 = vmatpush.msra.mxu2 %v70_v44  ;;  %v50_v2 = vld [vmem:[%s1298_s1 + $0x80] sm:$0xff]  ;;  %v209_v6 = vld [vmem:[%s1301_s3 + $0x68] sm:$0xff]  ;;  %v32_v7 = vld [vmem:[%s1299_s0 + $0x30] sm:$0xff] }
  0x19   :  { %135 = vmatpush.msra.mxu1 %v55_v43  ;;  %113 = vmatpush.msra.mxu0 %v38_v45  ;;  %v208_v8 = vld [vmem:[%s1301_s3 + $0x60] sm:$0xff]  ;;  %v33_v10 = vld [vmem:[%s1299_s0 + $0x38] sm:$0xff]  ;;  %v31_v12 = vld [vmem:[%s1299_s0 + $0x28] sm:$0xff] }
  0x1a   :  { %182 = vmatpush.msra.mxu3 %v86_v46  ;;  %160 = vmatpush.msra.mxu2 %v69_v48  ;;  %v30_v9 = vld [vmem:[%s1299_s0 + $0x20] sm:$0xff]  ;;  %v207_v11 = vld [vmem:[%s1301_s3 + $0x58] sm:$0xff]  ;;  %v206_v13 = vld [vmem:[%s1301_s3 + $0x50] sm:$0xff] }
  0x1b   :  { %136 = vmatpush.msra.mxu1 %v54_v47  ;;  %114 = vmatpush.msra.mxu0 %v37_v49  ;;  %v205_v14 = vld [vmem:[%s1301_s3 + $0x48] sm:$0xff]  ;;  %v204_v15 = vld [vmem:[%s1301_s3 + $0x40] sm:$0xff]  ;;  %v203_v16 = vld [vmem:[%s1301_s3 + $0x38] sm:$0xff] }
  0x1c   :  { %183 = vmatpush.msra.mxu3 %v85_v50  ;;  %161 = vmatpush.msra.mxu2 %v68_v52  ;;  %v202_v17 = vld [vmem:[%s1301_s3 + $0x30] sm:$0xff]  ;;  %v201_v18 = vld [vmem:[%s1301_s3 + $0x28] sm:$0xff]  ;;  %v200_v19 = vld [vmem:[%s1301_s3 + $0x20] sm:$0xff] }
  0x1d   :  { %137 = vmatpush.msra.mxu1 %v53_v51  ;;  %115 = vmatpush.msra.mxu0 %v36_v53  ;;  %v199_v20 = vld [vmem:[%s1301_s3 + $0x18] sm:$0xff]  ;;  %v198_v21 = vld [vmem:[%s1301_s3 + $0x10] sm:$0xff]  ;;  %v197_v22 = vld [vmem:[%s1301_s3 + $0x8] sm:$0xff] }
  0x1e   :  { %184 = vmatpush.msra.mxu3 %v84_v54  ;;  %162 = vmatpush.msra.mxu2 %v67_v56  ;;  %v196_v23 = vld [vmem:[%s1301_s3] sm:$0xff]  ;;  %v575_v24 = vld [vmem:[%s1301_s3 + $0xf8] sm:$0xff]  ;;  %v574_v25 = vld [vmem:[%s1301_s3 + $0xf0] sm:$0xff] }
  0x1f   :  { %138 = vmatpush.msra.mxu1 %v52_v55  ;;  %116 = vmatpush.msra.mxu0 %v35_v57  ;;  %v573_v26 = vld [vmem:[%s1301_s3 + $0xe8] sm:$0xff]  ;;  %v572_v27 = vld [vmem:[%s1301_s3 + $0xe0] sm:$0xff]  ;;  %v571_v28 = vld [vmem:[%s1301_s3 + $0xd8] sm:$0xff] }
  0x20   :  { %185 = vmatpush.msra.mxu3 %v83_v58  ;;  %163 = vmatpush.msra.mxu2 %v66_v60  ;;  %v570_v29 = vld [vmem:[%s1301_s3 + $0xd0] sm:$0xff]  ;;  %v611_v30 = vld [vmem:[%s1300_s2] ss:$0 sm:$0xff]  ;;  %v569_v31 = vld [vmem:[%s1301_s3 + $0xc8] sm:$0xff] }
  0x21   :  { %139 = vmatpush.msra.mxu1 %v51_v59  ;;  %117 = vmatpush.msra.mxu0 %v34_v61  ;;  %v568_v33 = vld [vmem:[%s1301_s3 + $0xc0] sm:$0xff]  ;;  %v567_v36 = vld [vmem:[%s1301_s3 + $0xb8] sm:$0xff]  ;;  %v566_v38 = vld [vmem:[%s1301_s3 + $0xb0] sm:$0xff] }
  0x22   :  { %164 = vmatmul.f32.vlgmr.msra.gmra.mxu2 %v28_v62  ;;  %186 = vmatpush.msra.mxu3 %v82_v63  ;;  %v565_v42 = vld [vmem:[%s1301_s3 + $0xa8] sm:$0xff]  ;;  %v564_v45 = vld [vmem:[%s1301_s3 + $0xa0] sm:$0xff]  ;;  %v563_v49 = vld [vmem:[%s1301_s3 + $0x98] sm:$0xff] }
  0x23   :  { %118 = vmatmul.f32.vlgmr.msra.gmra.mxu0 %v26_v0  ;;  %187 = vmatmul.f32.vlgmr.msra.gmra.mxu3 %v29_v1  ;;  %v562_v56 = vld [vmem:[%s1301_s3 + $0x90] sm:$0xff]  ;;  %v561_v57 = vld [vmem:[%s1301_s3 + $0x88] sm:$0xff]  ;;  %v560_v58 = vld [vmem:[%s1301_s3 + $0x80] sm:$0xff] }
  0x24   :  { %140 = vmatpush.msra.mxu1 %v50_v2  ;;  %216 = vmatpush.msrb.mxu0 %v211_v3  ;;  %v592_v59 = vld [vmem:[%s1301_s3 + $0x178] sm:$0xff]  ;;  %v591_v60 = vld [vmem:[%s1301_s3 + $0x170] sm:$0xff]  ;;  %v590_v61 = vld [vmem:[%s1301_s3 + $0x168] sm:$0xff] }
  0x25   :  { %141 = vmatmul.f32.vlgmr.msra.gmra.mxu1 %v27_v4  ;;  %310 = vmatpush.msrb.mxu2 %v592_v59  ;;  %v589_v62 = vld [vmem:[%s1301_s3 + $0x160] sm:$0xff]  ;;  %v588_v63 = vld [vmem:[%s1301_s3 + $0x158] sm:$0xff]  ;;  %v587_v0 = vld [vmem:[%s1301_s3 + $0x150] sm:$0xff] }
  0x26   :  { %217 = vmatpush.msrb.mxu0 %v210_v5  ;;  %263 = vmatpush.msrb.mxu1 %v575_v24  ;;  %v586_v1 = vld [vmem:[%s1301_s3 + $0x148] sm:$0xff]  ;;  %v585_v2 = vld [vmem:[%s1301_s3 + $0x140] sm:$0xff]  ;;  %v584_v3 = vld [vmem:[%s1301_s3 + $0x138] sm:$0xff] }
  0x27   :  { %311 = vmatpush.msrb.mxu2 %v591_v60  ;;  %v612_v4 = vld [vmem:[%s1302_s4] ss:$0 sm:$0xff]  ;;  %v583_v5 = vld [vmem:[%s1301_s3 + $0x130] sm:$0xff]  ;;  %v603_v24 = vld [vmem:[%s1301_s3 + $0x1c8] sm:$0xff] }
  0x28   :  { %218 = vmatpush.msrb.mxu0 %v209_v6  ;;  %264 = vmatpush.msrb.mxu1 %v574_v25  ;;  %v582_v6 = vld [vmem:[%s1301_s3 + $0x128] sm:$0xff]  ;;  %v602_v25 = vld [vmem:[%s1301_s3 + $0x1c0] sm:$0xff]  ;;  %v428_v59 = vld [vmem:[%s1303_s5 + $0x170] sm:$0xff] }
  0x29   :  { %312 = vmatpush.msrb.mxu2 %v590_v61  ;;  %v429_v60 = vld [vmem:[%s1303_s5 + $0x178] sm:$0xff]  ;;  %v422_v61 = vld [vmem:[%s1303_s5 + $0x140] sm:$0xff] }
  0x2a   :  { %167 = vmatmul.f32.gmra.mxu2 %v32_v7  ;;  %219 = vmatpush.msrb.mxu0 %v208_v8 }
  0x2b   :  { %121 = vmatmul.f32.gmra.mxu0 %v30_v9  ;;  %190 = vmatmul.f32.gmra.mxu3 %v33_v10  ;;  %v581_v9 = vld [vmem:[%s1301_s3 + $0x120] sm:$0xff] }
  0x2c   :  { %220 = vmatpush.msrb.mxu0 %v207_v11  ;;  %265 = vmatpush.msrb.mxu1 %v573_v26  ;;  %v580_v11 = vld [vmem:[%s1301_s3 + $0x118] sm:$0xff] }
  0x2d   :  { %144 = vmatmul.f32.gmra.mxu1 %v31_v12  ;;  %313 = vmatpush.msrb.mxu2 %v589_v62  ;;  %v601_v26 = vld [vmem:[%s1301_s3 + $0x1b8] sm:$0xff]  ;;  %v423_v62 = vld [vmem:[%s1303_s5 + $0x148] sm:$0xff] }
  0x2e   :  { %221 = vmatpush.msrb.mxu0 %v206_v13  ;;  %266 = vmatpush.msrb.mxu1 %v572_v27  ;;  %v613_v27 = vld [vmem:[%s1302_s4 + $0x1] ss:$0 sm:$0xff] }
  0x2f   :  { %314 = vmatpush.msrb.mxu2 %v588_v63  ;;  %v424_v63 = vld [vmem:[%s1303_s5 + $0x150] sm:$0xff] }
  0x30   :  { %222 = vmatpush.msrb.mxu0 %v205_v14  ;;  %267 = vmatpush.msrb.mxu1 %v571_v28  ;;  %v600_v28 = vld [vmem:[%s1301_s3 + $0x1b0] sm:$0xff] }
  0x31   :  { %315 = vmatpush.msrb.mxu2 %v587_v0  ;;  %v425_v0 = vld [vmem:[%s1303_s5 + $0x158] sm:$0xff] }
  0x32   :  { %223 = vmatpush.msrb.mxu0 %v204_v15  ;;  %268 = vmatpush.msrb.mxu1 %v570_v29  ;;  %v579_v15 = vld [vmem:[%s1301_s3 + $0x110] sm:$0xff]  ;;  %v599_v29 = vld [vmem:[%s1301_s3 + $0x1a8] sm:$0xff] }
  0x33   :  { %316 = vmatpush.msrb.mxu2 %v586_v1  ;;  %v418_v1 = vld [vmem:[%s1303_s5 + $0x120] sm:$0xff] }
  0x34   :  { %224 = vmatpush.msrb.mxu0 %v203_v16  ;;  %269 = vmatpush.msrb.mxu1 %v569_v31  ;;  %v578_v16 = vld [vmem:[%s1301_s3 + $0x108] sm:$0xff] }
  0x35   :  { %317 = vmatpush.msrb.mxu2 %v585_v2  ;;  %v419_v2 = vld [vmem:[%s1303_s5 + $0x128] sm:$0xff] }
  0x36   :  { %225 = vmatpush.msrb.mxu0 %v202_v17  ;;  %270 = vmatpush.msrb.mxu1 %v568_v33  ;;  %v577_v17 = vld [vmem:[%s1301_s3 + $0x100] sm:$0xff] }
  0x37   :  { %318 = vmatpush.msrb.mxu2 %v584_v3  ;;  %v420_v3 = vld [vmem:[%s1303_s5 + $0x130] sm:$0xff] }
  0x38   :  { %226 = vmatpush.msrb.mxu0 %v201_v18  ;;  %271 = vmatpush.msrb.mxu1 %v567_v36  ;;  %v609_v18 = vld [vmem:[%s1301_s3 + $0x1f8] sm:$0xff] }
  0x39   :  { %319 = vmatpush.msrb.mxu2 %v583_v5  ;;  %357 = vmatpush.msrb.mxu3 %v609_v18  ;;  %v414_v5 = vld [vmem:[%s1303_s5 + $0x100] sm:$0xff] }
  0x3a   :  { %227 = vmatpush.msrb.mxu0 %v200_v19  ;;  %272 = vmatpush.msrb.mxu1 %v566_v38  ;;  %v608_v19 = vld [vmem:[%s1301_s3 + $0x1f0] sm:$0xff]  ;;  %v402_v18 = vld [vmem:[%s1303_s5 + $0xa0] sm:$0xff] }
  0x3b   :  { %320 = vmatpush.msrb.mxu2 %v582_v6  ;;  %358 = vmatpush.msrb.mxu3 %v608_v19  ;;  %v596_v38 = vld [vmem:[%s1301_s3 + $0x190] sm:$0xff]  ;;  %v415_v6 = vld [vmem:[%s1303_s5 + $0x108] sm:$0xff] }
  0x3c   :  { %228 = vmatpush.msrb.mxu0 %v199_v20  ;;  %273 = vmatpush.msrb.mxu1 %v565_v42  ;;  %v607_v20 = vld [vmem:[%s1301_s3 + $0x1e8] sm:$0xff] }
  0x3d   :  { %321 = vmatpush.msrb.mxu2 %v581_v9  ;;  %359 = vmatpush.msrb.mxu3 %v607_v20  ;;  %v443_v42 = vld [vmem:[%s1303_s5 + $0x1e8] sm:$0xff]  ;;  %v410_v9 = vld [vmem:[%s1303_s5 + $0xe0] sm:$0xff] }
  0x3e   :  { %229 = vmatpush.msrb.mxu0 %v198_v21  ;;  %274 = vmatpush.msrb.mxu1 %v564_v45  ;;  %v606_v21 = vld [vmem:[%s1301_s3 + $0x1e0] sm:$0xff]  ;;  %v403_v19 = vld [vmem:[%s1303_s5 + $0xa8] sm:$0xff] }
  0x3f   :  { %322 = vmatpush.msrb.mxu2 %v580_v11  ;;  %360 = vmatpush.msrb.mxu3 %v606_v21  ;;  %v438_v45 = vld [vmem:[%s1303_s5 + $0x1c0] sm:$0xff]  ;;  %v412_v11 = vld [vmem:[%s1303_s5 + $0xf0] sm:$0xff] }
  0x40   :  { %230 = vmatpush.msrb.mxu0 %v197_v22  ;;  %275 = vmatpush.msrb.mxu1 %v563_v49  ;;  %v605_v22 = vld [vmem:[%s1301_s3 + $0x1d8] sm:$0xff]  ;;  %v434_v49 = vld [vmem:[%s1303_s5 + $0x1a0] sm:$0xff]  ;;  %v404_v21 = vld [vmem:[%s1303_s5 + $0xb0] sm:$0xff] }
  0x41   :  { %323 = vmatpush.msrb.mxu2 %v579_v15  ;;  %361 = vmatpush.msrb.mxu3 %v605_v22  ;;  %v407_v15 = vld [vmem:[%s1303_s5 + $0xc8] sm:$0xff]  ;;  %v405_v22 = vld [vmem:[%s1303_s5 + $0xb8] sm:$0xff] }
  0x42   :  { %231 = vmatpush.msrb.mxu0 %v196_v23  ;;  %276 = vmatpush.msrb.mxu1 %v562_v56  ;;  %v604_v23 = vld [vmem:[%s1301_s3 + $0x1d0] sm:$0xff]  ;;  %v433_v56 = vld [vmem:[%s1303_s5 + $0x198] sm:$0xff] }
  0x43   :  { %324 = vmatpush.msrb.mxu2 %v578_v16  ;;  %362 = vmatpush.msrb.mxu3 %v604_v23  ;;  %v408_v16 = vld [vmem:[%s1303_s5 + $0xd0] sm:$0xff] }
  0x44   :  { %277 = vmatpush.msrb.mxu1 %v561_v57  ;;  %v426_v57 = vld [vmem:[%s1303_s5 + $0x160] sm:$0xff] }
  0x45   :  { %325 = vmatpush.msrb.mxu2 %v577_v17  ;;  %363 = vmatpush.msrb.mxu3 %v603_v24  ;;  %v409_v17 = vld [vmem:[%s1303_s5 + $0xd8] sm:$0xff]  ;;  %v398_v24 = vld [vmem:[%s1303_s5 + $0x80] sm:$0xff] }
  0x46   :  { %278 = vmatpush.msrb.mxu1 %v560_v58  ;;  %v427_v58 = vld [vmem:[%s1303_s5 + $0x168] sm:$0xff] }
  0x47   :  { %364 = vmatpush.msrb.mxu3 %v602_v25  ;;  %v399_v25 = vld [vmem:[%s1303_s5 + $0x88] sm:$0xff] }
  0x48   :  { %479 = vmatpush.msra.mxu1 %v443_v42  ;;  %v388_v42 = vld [vmem:[%s1303_s5 + $0x30] sm:$0xff] }
  0x49   :  { %365 = vmatpush.msrb.mxu3 %v601_v26  ;;  %v400_v26 = vld [vmem:[%s1303_s5 + $0x90] sm:$0xff] }
  0x4b   :  { %366 = vmatpush.msrb.mxu3 %v600_v28  ;;  %v401_v28 = vld [vmem:[%s1303_s5 + $0x98] sm:$0xff] }
  0x4d   :  { %367 = vmatpush.msrb.mxu3 %v599_v29  ;;  %v394_v29 = vld [vmem:[%s1303_s5 + $0x60] sm:$0xff] }
  0xa0   :  { %v119_v32 = vpop.f32.mrf.mxu0 }
  0xa1   :  { %v120_v34 = vadd.f32 %v611_v30, %v119_v32  ;;  %v598_v32 = vld [vmem:[%s1301_s3 + $0x1a0] sm:$0xff] }
  0xa2   :  { %v142_v35 = vpop.f32.mrf.mxu1  ;;  %368 = vmatpush.msrb.mxu3 %v598_v32  ;;  %v397_v32 = vld [vmem:[%s1303_s5 + $0x78] sm:$0xff] }
  0xa3   :  { %v143_v37 = vadd.f32 %v142_v35, %v120_v34  ;;  %v597_v34 = vld [vmem:[%s1301_s3 + $0x198] sm:$0xff] }
  0xa4   :  { %369 = vmatpush.msrb.mxu3 %v597_v34 }
  0xa5   :  { %v165_v39 = vpop.f32.mrf.mxu2 }
  0xa6   :  { %v166_v40 = vadd.f32 %v165_v39, %v143_v37  ;;  %v188_v41 = vpop.f32.mrf.mxu3  ;;  %370 = vmatpush.msrb.mxu3 %v596_v38  ;;  %v595_v39 = vld [vmem:[%s1301_s3 + $0x188] sm:$0xff]  ;;  %v392_v38 = vld [vmem:[%s1303_s5 + $0x50] sm:$0xff] }
  0xa8   :  { %v189_v43 = vadd.f32 %v188_v41, %v166_v40  ;;  %v122_v44 = vpop.f32.mrf.mxu0  ;;  %371 = vmatpush.msrb.mxu3 %v595_v39  ;;  %v594_v40 = vld [vmem:[%s1301_s3 + $0x180] sm:$0xff]  ;;  %v393_v39 = vld [vmem:[%s1303_s5 + $0x58] sm:$0xff] }
  0xa9   :  { %v123_v46 = vadd.f32 %v611_v30, %v122_v44  ;;  %v442_v41 = vld [vmem:[%s1303_s5 + $0x1e0] sm:$0xff]  ;;  %v445_v44 = vld [vmem:[%s1303_s5 + $0x1f8] sm:$0xff] }
  0xaa   :  { %v194_v47 = vmax.f32 %v189_v43, 0.0  ;;  %v145_v48 = vpop.f32.mrf.mxu1  ;;  %372 = vmatpush.msrb.mxu3 %v594_v40  ;;  %v444_v43 = vld [vmem:[%s1303_s5 + $0x1f0] sm:$0xff]  ;;  %456 = vmatpush.msra.mxu0 %v442_v41  ;;  %v386_v40 = vld [vmem:[%s1303_s5 + $0x20] sm:$0xff]  ;;  %v387_v41 = vld [vmem:[%s1303_s5 + $0x28] sm:$0xff] }
  0xab   :  { %v146_v50 = vadd.f32 %v145_v48, %v123_v46  ;;  %v439_v46 = vld [vmem:[%s1303_s5 + $0x1c8] sm:$0xff]  ;;  %502 = vmatpush.msra.mxu2 %v444_v43  ;;  %v441_v48 = vld [vmem:[%s1303_s5 + $0x1d8] sm:$0xff] }
  0xac   :  { %232 = vmatmul.f32.vlgmr.msrb.gmra.mxu0 %v194_v47  ;;  %525 = vmatpush.msra.mxu3 %v445_v44  ;;  %v440_v47 = vld [vmem:[%s1303_s5 + $0x1d0] sm:$0xff]  ;;  %v389_v43 = vld [vmem:[%s1303_s5 + $0x38] sm:$0xff]  ;;  %v382_v44 = vld [vmem:[%s1303_s5] sm:$0xff] }
  0xad   :  { %v168_v51 = vpop.f32.mrf.mxu2  ;;  %457 = vmatpush.msra.mxu0 %v438_v45  ;;  %480 = vmatpush.msra.mxu1 %v439_v46  ;;  %v383_v45 = vld [vmem:[%s1303_s5 + $0x8] sm:$0xff]  ;;  %v384_v46 = vld [vmem:[%s1303_s5 + $0x10] sm:$0xff] }
  0xae   :  { %v169_v52 = vadd.f32 %v168_v51, %v146_v50  ;;  %v191_v53 = vpop.f32.mrf.mxu3  ;;  %v435_v50 = vld [vmem:[%s1303_s5 + $0x1a8] sm:$0xff]  ;;  %v436_v51 = vld [vmem:[%s1303_s5 + $0x1b0] sm:$0xff]  ;;  %503 = vmatpush.msra.mxu2 %v440_v47  ;;  %526 = vmatpush.msra.mxu3 %v441_v48  ;;  %v385_v47 = vld [vmem:[%s1303_s5 + $0x18] sm:$0xff] }
  0xaf   :  { %458 = vmatpush.msra.mxu0 %v434_v49  ;;  %481 = vmatpush.msra.mxu1 %v435_v50  ;;  %v615_v48 = vld [vmem:[%s1302_s4 + $0x3] ss:$0 sm:$0xff] }
  0xb0   :  { %v192_v54 = vadd.f32 %v191_v53, %v169_v52  ;;  %v437_v52 = vld [vmem:[%s1303_s5 + $0x1b8] sm:$0xff]  ;;  %v430_v53 = vld [vmem:[%s1303_s5 + $0x180] sm:$0xff]  ;;  %504 = vmatpush.msra.mxu2 %v436_v51 }
  0xb1   :  { %527 = vmatpush.msra.mxu3 %v437_v52  ;;  %459 = vmatpush.msra.mxu0 %v430_v53 }
  0xb2   :  { %v195_v55 = vmax.f32 %v192_v54, 0.0  ;;  %v431_v54 = vld [vmem:[%s1303_s5 + $0x188] sm:$0xff] }
  0xb3   :  { %482 = vmatpush.msra.mxu1 %v431_v54  ;;  %528 = vmatpush.msra.mxu3 %v433_v56 }
  0xb4   :  { %235 = vmatmul.f32.gmra.mxu0 %v195_v55  ;;  %v432_v55 = vld [vmem:[%s1303_s5 + $0x190] sm:$0xff] }
  0xb5   :  { %505 = vmatpush.msra.mxu2 %v432_v55  ;;  %460 = vmatpush.msra.mxu0 %v426_v57  ;;  %v446_v55 = vld [vmem:[%s1304_s6] sm:$0xf] }
  0xb6   :  { %483 = vmatpush.msra.mxu1 %v427_v58  ;;  %529 = vmatpush.msra.mxu3 %v429_v60  ;;  %v448_v56 = vperm.slane %v446_v55, 0  ;;  %v449_v57 = vperm.slane %v446_v55, 1 }
  0xb7   :  { %506 = vmatpush.msra.mxu2 %v428_v59  ;;  %461 = vmatpush.msra.mxu0 %v422_v61 }
  0xb8   :  { %484 = vmatpush.msra.mxu1 %v423_v62  ;;  %530 = vmatpush.msra.mxu3 %v425_v0  ;;  %v450_v62 = vperm.slane %v446_v55, 2 }
  0xb9   :  { %507 = vmatpush.msra.mxu2 %v424_v63  ;;  %462 = vmatpush.msra.mxu0 %v418_v1  ;;  %v451_v63 = vperm.slane %v446_v55, 3 }
  0xba   :  { %485 = vmatpush.msra.mxu1 %v419_v2 }
  0xbb   :  { %508 = vmatpush.msra.mxu2 %v420_v3  ;;  %463 = vmatpush.msra.mxu0 %v414_v5 }
  0xbc   :  { %486 = vmatpush.msra.mxu1 %v415_v6 }
  0xbd   :  { %464 = vmatpush.msra.mxu0 %v410_v9 }
 0x129   :  { %v233_v7 = vpop.f32.mrf.mxu0 }
 0x12a   :  { %v234_v8 = vadd.f32 %v612_v4, %v233_v7  ;;  %v416_v7 = vld [vmem:[%s1303_s5 + $0x110] sm:$0xff] }
 0x12b   :  { %509 = vmatpush.msra.mxu2 %v416_v7 }
 0x12c   :  { %v239_v10 = vmax.f32 %v234_v8, 0.0  ;;  %v417_v8 = vld [vmem:[%s1303_s5 + $0x118] sm:$0xff] }
 0x12d   :  { %510 = vmatpush.msra.mxu2 %v412_v11 }
 0x12e   :  { %279 = vmatmul.f32.vlgmr.msrb.gmra.mxu1 %v239_v10  ;;  %v411_v10 = vld [vmem:[%s1303_s5 + $0xe8] sm:$0xff] }
 0x12f   :  { %487 = vmatpush.msra.mxu1 %v411_v10  ;;  %511 = vmatpush.msra.mxu2 %v408_v16 }
 0x131   :  { %v236_v12 = vpop.f32.mrf.mxu0  ;;  %488 = vmatpush.msra.mxu1 %v407_v15  ;;  %512 = vmatpush.msra.mxu2 %v404_v21 }
 0x132   :  { %v237_v13 = vadd.f32 %v612_v4, %v236_v12  ;;  %v421_v4 = vld [vmem:[%s1303_s5 + $0x138] sm:$0xff] }
 0x133   :  { %531 = vmatpush.msra.mxu3 %v421_v4  ;;  %v413_v12 = vld [vmem:[%s1303_s5 + $0xf8] sm:$0xff]  ;;  %489 = vmatpush.msra.mxu1 %v403_v19 }
 0x134   :  { %v240_v14 = vmax.f32 %v237_v13, 0.0  ;;  %v614_v13 = vld [vmem:[%s1302_s4 + $0x2] ss:$0 sm:$0xff]  ;;  %513 = vmatpush.msra.mxu2 %v400_v26 }
 0x135   :  { %532 = vmatpush.msra.mxu3 %v417_v8  ;;  %490 = vmatpush.msra.mxu1 %v399_v25 }
 0x136   :  { %282 = vmatmul.f32.gmra.mxu1 %v240_v14  ;;  %v406_v14 = vld [vmem:[%s1303_s5 + $0xc0] sm:$0xff] }
 0x137   :  { %533 = vmatpush.msra.mxu3 %v413_v12  ;;  %465 = vmatpush.msra.mxu0 %v406_v14 }
 0x139   :  { %534 = vmatpush.msra.mxu3 %v409_v17  ;;  %466 = vmatpush.msra.mxu0 %v402_v18 }
 0x13b   :  { %535 = vmatpush.msra.mxu3 %v405_v22  ;;  %467 = vmatpush.msra.mxu0 %v398_v24 }
 0x13d   :  { %536 = vmatpush.msra.mxu3 %v401_v28  ;;  %468 = vmatpush.msra.mxu0 %v394_v29 }
 0x13f   :  { %537 = vmatpush.msra.mxu3 %v397_v32 }
 0x141   :  { %538 = vmatpush.msra.mxu3 %v393_v39 }
 0x143   :  { %539 = vmatpush.msra.mxu3 %v389_v43 }
 0x145   :  { %540 = vmatpush.msra.mxu3 %v385_v47 }
 0x1ab   :  { %v280_v30 = vpop.f32.mrf.mxu1 }
 0x1ac   :  { %v281_v31 = vadd.f32 %v613_v27, %v280_v30  ;;  %v395_v30 = vld [vmem:[%s1303_s5 + $0x68] sm:$0xff] }
 0x1ad   :  { %491 = vmatpush.msra.mxu1 %v395_v30 }
 0x1ae   :  { %v286_v33 = vmax.f32 %v281_v31, 0.0  ;;  %v396_v31 = vld [vmem:[%s1303_s5 + $0x70] sm:$0xff] }
 0x1af   :  { %514 = vmatpush.msra.mxu2 %v396_v31 }
 0x1b0   :  { %326 = vmatmul.f32.vlgmr.msrb.gmra.mxu2 %v286_v33 }
 0x1b1   :  { %515 = vmatpush.msra.mxu2 %v392_v38 }
 0x1b3   :  { %v283_v35 = vpop.f32.mrf.mxu1  ;;  %516 = vmatpush.msra.mxu2 %v388_v42 }
 0x1b4   :  { %v284_v36 = vadd.f32 %v613_v27, %v283_v35 }
 0x1b5   :  { %517 = vmatpush.msra.mxu2 %v384_v46 }
 0x1b6   :  { %v287_v37 = vmax.f32 %v284_v36, 0.0  ;;  %v390_v36 = vld [vmem:[%s1303_s5 + $0x40] sm:$0xff] }
 0x1b7   :  { %469 = vmatpush.msra.mxu0 %v390_v36 }
 0x1b8   :  { %329 = vmatmul.f32.gmra.mxu2 %v287_v37  ;;  %v391_v37 = vld [vmem:[%s1303_s5 + $0x48] sm:$0xff] }
 0x1b9   :  { %492 = vmatpush.msra.mxu1 %v391_v37  ;;  %470 = vmatpush.msra.mxu0 %v386_v40 }
 0x1bb   :  { %493 = vmatpush.msra.mxu1 %v387_v41  ;;  %471 = vmatpush.msra.mxu0 %v382_v44 }
 0x1bd   :  { %494 = vmatpush.msra.mxu1 %v383_v45 }
 0x233   :  { %v327_v20 = vpop.f32.mrf.mxu2 }
 0x234   :  { %v328_v23 = vadd.f32 %v614_v13, %v327_v20 }
 0x236   :  { %v333_v27 = vmax.f32 %v328_v23, 0.0 }
 0x238   :  { %373 = vmatmul.f32.vlgmr.msrb.gmra.mxu3 %v333_v27 }
 0x23b   :  { %v330_v33 = vpop.f32.mrf.mxu2 }
 0x23c   :  { %v331_v34 = vadd.f32 %v614_v13, %v330_v33 }
 0x23e   :  { %v334_v35 = vmax.f32 %v331_v34, 0.0 }
 0x240   :  { %376 = vmatmul.f32.gmra.mxu3 %v334_v35 }
 0x2bb   :  { %v374_v49 = vpop.f32.mrf.mxu3 }
 0x2bc   :  { %v375_v50 = vadd.f32 %v615_v48, %v374_v49 }
 0x2be   :  { %v380_v51 = vmax.f32 %v375_v50, 0.0 }
 0x2c0   :  { %472 = vmatmul.f32.vlgmr.msra.gmra.mxu0 %v380_v51  ;;  %495 = vmatmul.f32.vlgmr.msra.gmra.mxu1 %v380_v51 }
 0x2c1   :  { %518 = vmatmul.f32.vlgmr.msra.gmra.mxu2 %v380_v51  ;;  %541 = vmatmul.f32.vlgmr.msra.gmra.mxu3 %v380_v51 }
 0x2c3   :  { %v377_v52 = vpop.f32.mrf.mxu3 }
 0x2c4   :  { %v378_v53 = vadd.f32 %v615_v48, %v377_v52 }
 0x2c6   :  { %v381_v54 = vmax.f32 %v378_v53, 0.0 }
 0x2c8   :  { %475 = vmatmul.f32.gmra.mxu0 %v381_v54  ;;  %498 = vmatmul.f32.gmra.mxu1 %v381_v54 }
 0x2c9   :  { %521 = vmatmul.f32.gmra.mxu2 %v381_v54  ;;  %544 = vmatmul.f32.gmra.mxu3 %v381_v54 }
 0x33d   :  { %v473_v58 = vpop.f32.mrf.mxu0  ;;  %v496_v59 = vpop.f32.mrf.mxu1 }
 0x33e   :  { %v474_v60 = vadd.f32 %v473_v58, %v448_v56  ;;  %v497_v61 = vadd.f32 %v496_v59, %v449_v57 }
 0x340   :  { %548 = vst [vmem:[%s1305_s7] sm:$0xff] %v474_v60 }
 0x341   :  { %549 = vst [vmem:[%s1305_s7 + $0x8] sm:$0xff] %v497_v61 }
 0x344   :  { %v519_v0 = vpop.f32.mrf.mxu2  ;;  %v542_v1 = vpop.f32.mrf.mxu3 }
 0x345   :  { %v520_v2 = vadd.f32 %v519_v0, %v450_v62  ;;  %v543_v3 = vadd.f32 %v542_v1, %v451_v63  ;;  %v476_v4 = vpop.f32.mrf.mxu0  ;;  %v499_v5 = vpop.f32.mrf.mxu1 }
 0x346   :  { %v477_v6 = vadd.f32 %v476_v4, %v448_v56  ;;  %v500_v7 = vadd.f32 %v499_v5, %v449_v57 }
 0x347   :  { %550 = vst [vmem:[%s1305_s7 + $0x10] sm:$0xff] %v520_v2 }
 0x348   :  { %551 = vst [vmem:[%s1305_s7 + $0x18] sm:$0xff] %v543_v3 }
 0x349   :  { %552 = vst [vmem:[%s1305_s7 + $0x20] sm:$0xff] %v477_v6 }
 0x34a   :  { %553 = vst [vmem:[%s1305_s7 + $0x28] sm:$0xff] %v500_v7 }
 0x34c   :  { %v522_v8 = vpop.f32.mrf.mxu2  ;;  %v545_v9 = vpop.f32.mrf.mxu3 }
 0x34d   :  { %v523_v10 = vadd.f32 %v522_v8, %v450_v62  ;;  %v546_v11 = vadd.f32 %v545_v9, %v451_v63 }
 0x34f   :  { %554 = vst [vmem:[%s1305_s7 + $0x30] sm:$0xff] %v523_v10 }
 0x350   :  { %555 = vst [vmem:[%s1305_s7 + $0x38] sm:$0xff] %v546_v11 }

// kernel: _forward.1
= control target key start
LH: loop header
LB: loop body
LE: loop exit
PB: predicated region body
PF: predicated region fallthrough
CT: control target
= control target key end

     0   :  { %s1298_s1 = inlined_call_operand.vmem [shape: f32[512,128], index: 1, kind: input, shape index: {}]   ;;  %s1299_s0 = inlined_call_operand.vmem [shape: f32[16,512], index: 0, kind: input, shape index: {}]   ;;  %s1300_s2 = inlined_call_operand.vmem [shape: f32[1,128], index: 2, kind: input, shape index: {}]   ;;  %s1301_s3 = inlined_call_operand.vmem [shape: f32[4,128,128], index: 3, kind: input, shape index: {}]   ;;  %s1302_s4 = inlined_call_operand.vmem [shape: f32[4,1,128], index: 4, kind: input, shape index: {}]   ;;  %s1303_s5 = inlined_call_operand.vmem [shape: f32[128,512], index: 5, kind: input, shape index: {}]   ;;  %s1304_s6 = inlined_call_operand.vmem [shape: f32[1,512], index: 6, kind: input, shape index: {}]   ;;  %s1305_s7 = inlined_call_operand.vmem [shape: f32[16,512], index: 7, kind: output, shape index: {}]  }
   0x1   :  { %v81_v0 = vld [vmem:[%s1298_s1 + $0x178] sm:$0xff]  ;;  %v80_v2 = vld [vmem:[%s1298_s1 + $0x170] sm:$0xff]  ;;  %v79_v6 = vld [vmem:[%s1298_s1 + $0x168] sm:$0xff] }
   0x2   :  { %v49_v1 = vld [vmem:[%s1298_s1 + $0x78] sm:$0xff]  ;;  %148 = vmatpush.msra.mxu2 %v81_v0  ;;  %v48_v4 = vld [vmem:[%s1298_s1 + $0x70] sm:$0xff]  ;;  %v47_v8 = vld [vmem:[%s1298_s1 + $0x68] sm:$0xff] }
   0x3   :  { %102 = vmatpush.msra.mxu0 %v49_v1  ;;  %v97_v3 = vld [vmem:[%s1298_s1 + $0x1f8] sm:$0xff]  ;;  %v96_v7 = vld [vmem:[%s1298_s1 + $0x1f0] sm:$0xff]  ;;  %v95_v10 = vld [vmem:[%s1298_s1 + $0x1e8] sm:$0xff] }
   0x4   :  { %v65_v5 = vld [vmem:[%s1298_s1 + $0xf8] sm:$0xff]  ;;  %171 = vmatpush.msra.mxu3 %v97_v3  ;;  %149 = vmatpush.msra.mxu2 %v80_v2  ;;  %v64_v9 = vld [vmem:[%s1298_s1 + $0xf0] sm:$0xff]  ;;  %v78_v11 = vld [vmem:[%s1298_s1 + $0x160] sm:$0xff] }
   0x5   :  { %125 = vmatpush.msra.mxu1 %v65_v5  ;;  %103 = vmatpush.msra.mxu0 %v48_v4  ;;  %v46_v12 = vld [vmem:[%s1298_s1 + $0x60] sm:$0xff]  ;;  %v63_v13 = vld [vmem:[%s1298_s1 + $0xe8] sm:$0xff]  ;;  %v77_v16 = vld [vmem:[%s1298_s1 + $0x158] sm:$0xff] }
   0x6   :  { %172 = vmatpush.msra.mxu3 %v96_v7  ;;  %150 = vmatpush.msra.mxu2 %v79_v6  ;;  %v94_v14 = vld [vmem:[%s1298_s1 + $0x1e0] sm:$0xff]  ;;  %v45_v17 = vld [vmem:[%s1298_s1 + $0x58] sm:$0xff]  ;;  %v76_v20 = vld [vmem:[%s1298_s1 + $0x150] sm:$0xff] }
   0x7   :  { %126 = vmatpush.msra.mxu1 %v64_v9  ;;  %104 = vmatpush.msra.mxu0 %v47_v8  ;;  %v62_v15 = vld [vmem:[%s1298_s1 + $0xe0] sm:$0xff]  ;;  %v93_v18 = vld [vmem:[%s1298_s1 + $0x1d8] sm:$0xff]  ;;  %v44_v21 = vld [vmem:[%s1298_s1 + $0x50] sm:$0xff] }
   0x8   :  { %173 = vmatpush.msra.mxu3 %v95_v10  ;;  %151 = vmatpush.msra.mxu2 %v78_v11  ;;  %v61_v19 = vld [vmem:[%s1298_s1 + $0xd8] sm:$0xff]  ;;  %v92_v22 = vld [vmem:[%s1298_s1 + $0x1d0] sm:$0xff]  ;;  %v75_v24 = vld [vmem:[%s1298_s1 + $0x148] sm:$0xff] }
   0x9   :  { %127 = vmatpush.msra.mxu1 %v63_v13  ;;  %105 = vmatpush.msra.mxu0 %v46_v12  ;;  %v60_v23 = vld [vmem:[%s1298_s1 + $0xd0] sm:$0xff]  ;;  %v43_v25 = vld [vmem:[%s1298_s1 + $0x48] sm:$0xff]  ;;  %v74_v28 = vld [vmem:[%s1298_s1 + $0x140] sm:$0xff] }
   0xa   :  { %174 = vmatpush.msra.mxu3 %v94_v14  ;;  %152 = vmatpush.msra.mxu2 %v77_v16  ;;  %v91_v26 = vld [vmem:[%s1298_s1 + $0x1c8] sm:$0xff]  ;;  %v42_v29 = vld [vmem:[%s1298_s1 + $0x40] sm:$0xff]  ;;  %v73_v32 = vld [vmem:[%s1298_s1 + $0x138] sm:$0xff] }
   0xb   :  { %128 = vmatpush.msra.mxu1 %v62_v15  ;;  %106 = vmatpush.msra.mxu0 %v45_v17  ;;  %v59_v27 = vld [vmem:[%s1298_s1 + $0xc8] sm:$0xff]  ;;  %v90_v30 = vld [vmem:[%s1298_s1 + $0x1c0] sm:$0xff]  ;;  %v41_v33 = vld [vmem:[%s1298_s1 + $0x38] sm:$0xff] }
   0xc   :  { %175 = vmatpush.msra.mxu3 %v93_v18  ;;  %153 = vmatpush.msra.mxu2 %v76_v20  ;;  %v58_v31 = vld [vmem:[%s1298_s1 + $0xc0] sm:$0xff]  ;;  %v89_v34 = vld [vmem:[%s1298_s1 + $0x1b8] sm:$0xff]  ;;  %v72_v36 = vld [vmem:[%s1298_s1 + $0x130] sm:$0xff] }
   0xd   :  { %129 = vmatpush.msra.mxu1 %v61_v19  ;;  %107 = vmatpush.msra.mxu0 %v44_v21  ;;  %v57_v35 = vld [vmem:[%s1298_s1 + $0xb8] sm:$0xff]  ;;  %v40_v37 = vld [vmem:[%s1298_s1 + $0x30] sm:$0xff]  ;;  %v71_v40 = vld [vmem:[%s1298_s1 + $0x128] sm:$0xff] }
   0xe   :  { %176 = vmatpush.msra.mxu3 %v92_v22  ;;  %154 = vmatpush.msra.mxu2 %v75_v24  ;;  %v88_v38 = vld [vmem:[%s1298_s1 + $0x1b0] sm:$0xff]  ;;  %v39_v41 = vld [vmem:[%s1298_s1 + $0x28] sm:$0xff]  ;;  %v70_v44 = vld [vmem:[%s1298_s1 + $0x120] sm:$0xff] }
   0xf   :  { %130 = vmatpush.msra.mxu1 %v60_v23  ;;  %108 = vmatpush.msra.mxu0 %v43_v25  ;;  %v56_v39 = vld [vmem:[%s1298_s1 + $0xb0] sm:$0xff]  ;;  %v87_v42 = vld [vmem:[%s1298_s1 + $0x1a8] sm:$0xff]  ;;  %v38_v45 = vld [vmem:[%s1298_s1 + $0x20] sm:$0xff] }
  0x10   :  { %177 = vmatpush.msra.mxu3 %v91_v26  ;;  %155 = vmatpush.msra.mxu2 %v74_v28  ;;  %v55_v43 = vld [vmem:[%s1298_s1 + $0xa8] sm:$0xff]  ;;  %v86_v46 = vld [vmem:[%s1298_s1 + $0x1a0] sm:$0xff]  ;;  %v69_v48 = vld [vmem:[%s1298_s1 + $0x118] sm:$0xff] }
  0x11   :  { %131 = vmatpush.msra.mxu1 %v59_v27  ;;  %109 = vmatpush.msra.mxu0 %v42_v29  ;;  %v54_v47 = vld [vmem:[%s1298_s1 + $0xa0] sm:$0xff]  ;;  %v37_v49 = vld [vmem:[%s1298_s1 + $0x18] sm:$0xff]  ;;  %v68_v52 = vld [vmem:[%s1298_s1 + $0x110] sm:$0xff] }
  0x12   :  { %178 = vmatpush.msra.mxu3 %v90_v30  ;;  %156 = vmatpush.msra.mxu2 %v73_v32  ;;  %v85_v50 = vld [vmem:[%s1298_s1 + $0x198] sm:$0xff]  ;;  %v36_v53 = vld [vmem:[%s1298_s1 + $0x10] sm:$0xff]  ;;  %v67_v56 = vld [vmem:[%s1298_s1 + $0x108] sm:$0xff] }
  0x13   :  { %132 = vmatpush.msra.mxu1 %v58_v31  ;;  %110 = vmatpush.msra.mxu0 %v41_v33  ;;  %v53_v51 = vld [vmem:[%s1298_s1 + $0x98] sm:$0xff]  ;;  %v84_v54 = vld [vmem:[%s1298_s1 + $0x190] sm:$0xff]  ;;  %v35_v57 = vld [vmem:[%s1298_s1 + $0x8] sm:$0xff] }
  0x14   :  { %179 = vmatpush.msra.mxu3 %v89_v34  ;;  %157 = vmatpush.msra.mxu2 %v72_v36  ;;  %v52_v55 = vld [vmem:[%s1298_s1 + $0x90] sm:$0xff]  ;;  %v83_v58 = vld [vmem:[%s1298_s1 + $0x188] sm:$0xff]  ;;  %v66_v60 = vld [vmem:[%s1298_s1 + $0x100] sm:$0xff] }
  0x15   :  { %133 = vmatpush.msra.mxu1 %v57_v35  ;;  %111 = vmatpush.msra.mxu0 %v40_v37  ;;  %v51_v59 = vld [vmem:[%s1298_s1 + $0x88] sm:$0xff]  ;;  %v34_v61 = vld [vmem:[%s1298_s1] sm:$0xff]  ;;  %v28_v62 = vld [vmem:[%s1299_s0 + $0x10] sm:$0xff] }
  0x16   :  { %180 = vmatpush.msra.mxu3 %v88_v38  ;;  %158 = vmatpush.msra.mxu2 %v71_v40  ;;  %v82_v63 = vld [vmem:[%s1298_s1 + $0x180] sm:$0xff]  ;;  %v29_v1 = vld [vmem:[%s1299_s0 + $0x18] sm:$0xff]  ;;  %v27_v4 = vld [vmem:[%s1299_s0 + $0x8] sm:$0xff] }
  0x17   :  { %134 = vmatpush.msra.mxu1 %v56_v39  ;;  %112 = vmatpush.msra.mxu0 %v39_v41  ;;  %v26_v0 = vld [vmem:[%s1299_s0] sm:$0xff]  ;;  %v211_v3 = vld [vmem:[%s1301_s3 + $0x78] sm:$0xff]  ;;  %v210_v5 = vld [vmem:[%s1301_s3 + $0x70] sm:$0xff] }
  0x18   :  { %181 = vmatpush.msra.mxu3 %v87_v42  ;;  %159 = vmatpush.msra.mxu2 %v70_v44  ;;  %v50_v2 = vld [vmem:[%s1298_s1 + $0x80] sm:$0xff]  ;;  %v209_v6 = vld [vmem:[%s1301_s3 + $0x68] sm:$0xff]  ;;  %v32_v7 = vld [vmem:[%s1299_s0 + $0x30] sm:$0xff] }
  0x19   :  { %135 = vmatpush.msra.mxu1 %v55_v43  ;;  %113 = vmatpush.msra.mxu0 %v38_v45  ;;  %v208_v8 = vld [vmem:[%s1301_s3 + $0x60] sm:$0xff]  ;;  %v33_v10 = vld [vmem:[%s1299_s0 + $0x38] sm:$0xff]  ;;  %v31_v12 = vld [vmem:[%s1299_s0 + $0x28] sm:$0xff] }
  0x1a   :  { %182 = vmatpush.msra.mxu3 %v86_v46  ;;  %160 = vmatpush.msra.mxu2 %v69_v48  ;;  %v30_v9 = vld [vmem:[%s1299_s0 + $0x20] sm:$0xff]  ;;  %v207_v11 = vld [vmem:[%s1301_s3 + $0x58] sm:$0xff]  ;;  %v206_v13 = vld [vmem:[%s1301_s3 + $0x50] sm:$0xff] }
  0x1b   :  { %136 = vmatpush.msra.mxu1 %v54_v47  ;;  %114 = vmatpush.msra.mxu0 %v37_v49  ;;  %v205_v14 = vld [vmem:[%s1301_s3 + $0x48] sm:$0xff]  ;;  %v204_v15 = vld [vmem:[%s1301_s3 + $0x40] sm:$0xff]  ;;  %v203_v16 = vld [vmem:[%s1301_s3 + $0x38] sm:$0xff] }
  0x1c   :  { %183 = vmatpush.msra.mxu3 %v85_v50  ;;  %161 = vmatpush.msra.mxu2 %v68_v52  ;;  %v202_v17 = vld [vmem:[%s1301_s3 + $0x30] sm:$0xff]  ;;  %v201_v18 = vld [vmem:[%s1301_s3 + $0x28] sm:$0xff]  ;;  %v200_v19 = vld [vmem:[%s1301_s3 + $0x20] sm:$0xff] }
  0x1d   :  { %137 = vmatpush.msra.mxu1 %v53_v51  ;;  %115 = vmatpush.msra.mxu0 %v36_v53  ;;  %v199_v20 = vld [vmem:[%s1301_s3 + $0x18] sm:$0xff]  ;;  %v198_v21 = vld [vmem:[%s1301_s3 + $0x10] sm:$0xff]  ;;  %v197_v22 = vld [vmem:[%s1301_s3 + $0x8] sm:$0xff] }
  0x1e   :  { %184 = vmatpush.msra.mxu3 %v84_v54  ;;  %162 = vmatpush.msra.mxu2 %v67_v56  ;;  %v196_v23 = vld [vmem:[%s1301_s3] sm:$0xff]  ;;  %v575_v24 = vld [vmem:[%s1301_s3 + $0xf8] sm:$0xff]  ;;  %v574_v25 = vld [vmem:[%s1301_s3 + $0xf0] sm:$0xff] }
  0x1f   :  { %138 = vmatpush.msra.mxu1 %v52_v55  ;;  %116 = vmatpush.msra.mxu0 %v35_v57  ;;  %v573_v26 = vld [vmem:[%s1301_s3 + $0xe8] sm:$0xff]  ;;  %v572_v27 = vld [vmem:[%s1301_s3 + $0xe0] sm:$0xff]  ;;  %v571_v28 = vld [vmem:[%s1301_s3 + $0xd8] sm:$0xff] }
  0x20   :  { %185 = vmatpush.msra.mxu3 %v83_v58  ;;  %163 = vmatpush.msra.mxu2 %v66_v60  ;;  %v570_v29 = vld [vmem:[%s1301_s3 + $0xd0] sm:$0xff]  ;;  %v611_v30 = vld [vmem:[%s1300_s2] ss:$0 sm:$0xff]  ;;  %v569_v31 = vld [vmem:[%s1301_s3 + $0xc8] sm:$0xff] }
  0x21   :  { %139 = vmatpush.msra.mxu1 %v51_v59  ;;  %117 = vmatpush.msra.mxu0 %v34_v61  ;;  %v568_v33 = vld [vmem:[%s1301_s3 + $0xc0] sm:$0xff]  ;;  %v567_v36 = vld [vmem:[%s1301_s3 + $0xb8] sm:$0xff]  ;;  %v566_v38 = vld [vmem:[%s1301_s3 + $0xb0] sm:$0xff] }
  0x22   :  { %164 = vmatmul.f32.vlgmr.msra.gmra.mxu2 %v28_v62  ;;  %186 = vmatpush.msra.mxu3 %v82_v63  ;;  %v565_v42 = vld [vmem:[%s1301_s3 + $0xa8] sm:$0xff]  ;;  %v564_v45 = vld [vmem:[%s1301_s3 + $0xa0] sm:$0xff]  ;;  %v563_v49 = vld [vmem:[%s1301_s3 + $0x98] sm:$0xff] }
  0x23   :  { %118 = vmatmul.f32.vlgmr.msra.gmra.mxu0 %v26_v0  ;;  %187 = vmatmul.f32.vlgmr.msra.gmra.mxu3 %v29_v1  ;;  %v562_v56 = vld [vmem:[%s1301_s3 + $0x90] sm:$0xff]  ;;  %v561_v57 = vld [vmem:[%s1301_s3 + $0x88] sm:$0xff]  ;;  %v560_v58 = vld [vmem:[%s1301_s3 + $0x80] sm:$0xff] }
  0x24   :  { %140 = vmatpush.msra.mxu1 %v50_v2  ;;  %216 = vmatpush.msrb.mxu0 %v211_v3  ;;  %v592_v59 = vld [vmem:[%s1301_s3 + $0x178] sm:$0xff]  ;;  %v591_v60 = vld [vmem:[%s1301_s3 + $0x170] sm:$0xff]  ;;  %v590_v61 = vld [vmem:[%s1301_s3 + $0x168] sm:$0xff] }
  0x25   :  { %141 = vmatmul.f32.vlgmr.msra.gmra.mxu1 %v27_v4  ;;  %310 = vmatpush.msrb.mxu2 %v592_v59  ;;  %v589_v62 = vld [vmem:[%s1301_s3 + $0x160] sm:$0xff]  ;;  %v588_v63 = vld [vmem:[%s1301_s3 + $0x158] sm:$0xff]  ;;  %v587_v0 = vld [vmem:[%s1301_s3 + $0x150] sm:$0xff] }
  0x26   :  { %217 = vmatpush.msrb.mxu0 %v210_v5  ;;  %263 = vmatpush.msrb.mxu1 %v575_v24  ;;  %v586_v1 = vld [vmem:[%s1301_s3 + $0x148] sm:$0xff]  ;;  %v585_v2 = vld [vmem:[%s1301_s3 + $0x140] sm:$0xff]  ;;  %v584_v3 = vld [vmem:[%s1301_s3 + $0x138] sm:$0xff] }
  0x27   :  { %311 = vmatpush.msrb.mxu2 %v591_v60  ;;  %v612_v4 = vld [vmem:[%s1302_s4] ss:$0 sm:$0xff]  ;;  %v583_v5 = vld [vmem:[%s1301_s3 + $0x130] sm:$0xff]  ;;  %v603_v24 = vld [vmem:[%s1301_s3 + $0x1c8] sm:$0xff] }
  0x28   :  { %218 = vmatpush.msrb.mxu0 %v209_v6  ;;  %264 = vmatpush.msrb.mxu1 %v574_v25  ;;  %v582_v6 = vld [vmem:[%s1301_s3 + $0x128] sm:$0xff]  ;;  %v602_v25 = vld [vmem:[%s1301_s3 + $0x1c0] sm:$0xff]  ;;  %v428_v59 = vld [vmem:[%s1303_s5 + $0x170] sm:$0xff] }
  0x29   :  { %312 = vmatpush.msrb.mxu2 %v590_v61  ;;  %v429_v60 = vld [vmem:[%s1303_s5 + $0x178] sm:$0xff]  ;;  %v422_v61 = vld [vmem:[%s1303_s5 + $0x140] sm:$0xff] }
  0x2a   :  { %167 = vmatmul.f32.gmra.mxu2 %v32_v7  ;;  %219 = vmatpush.msrb.mxu0 %v208_v8 }
  0x2b   :  { %121 = vmatmul.f32.gmra.mxu0 %v30_v9  ;;  %190 = vmatmul.f32.gmra.mxu3 %v33_v10  ;;  %v581_v9 = vld [vmem:[%s1301_s3 + $0x120] sm:$0xff] }
  0x2c   :  { %220 = vmatpush.msrb.mxu0 %v207_v11  ;;  %265 = vmatpush.msrb.mxu1 %v573_v26  ;;  %v580_v11 = vld [vmem:[%s1301_s3 + $0x118] sm:$0xff] }
  0x2d   :  { %144 = vmatmul.f32.gmra.mxu1 %v31_v12  ;;  %313 = vmatpush.msrb.mxu2 %v589_v62  ;;  %v601_v26 = vld [vmem:[%s1301_s3 + $0x1b8] sm:$0xff]  ;;  %v423_v62 = vld [vmem:[%s1303_s5 + $0x148] sm:$0xff] }
  0x2e   :  { %221 = vmatpush.msrb.mxu0 %v206_v13  ;;  %266 = vmatpush.msrb.mxu1 %v572_v27  ;;  %v613_v27 = vld [vmem:[%s1302_s4 + $0x1] ss:$0 sm:$0xff] }
  0x2f   :  { %314 = vmatpush.msrb.mxu2 %v588_v63  ;;  %v424_v63 = vld [vmem:[%s1303_s5 + $0x150] sm:$0xff] }
  0x30   :  { %222 = vmatpush.msrb.mxu0 %v205_v14  ;;  %267 = vmatpush.msrb.mxu1 %v571_v28  ;;  %v600_v28 = vld [vmem:[%s1301_s3 + $0x1b0] sm:$0xff] }
  0x31   :  { %315 = vmatpush.msrb.mxu2 %v587_v0  ;;  %v425_v0 = vld [vmem:[%s1303_s5 + $0x158] sm:$0xff] }
  0x32   :  { %223 = vmatpush.msrb.mxu0 %v204_v15  ;;  %268 = vmatpush.msrb.mxu1 %v570_v29  ;;  %v579_v15 = vld [vmem:[%s1301_s3 + $0x110] sm:$0xff]  ;;  %v599_v29 = vld [vmem:[%s1301_s3 + $0x1a8] sm:$0xff] }
  0x33   :  { %316 = vmatpush.msrb.mxu2 %v586_v1  ;;  %v418_v1 = vld [vmem:[%s1303_s5 + $0x120] sm:$0xff] }
  0x34   :  { %224 = vmatpush.msrb.mxu0 %v203_v16  ;;  %269 = vmatpush.msrb.mxu1 %v569_v31  ;;  %v578_v16 = vld [vmem:[%s1301_s3 + $0x108] sm:$0xff] }
  0x35   :  { %317 = vmatpush.msrb.mxu2 %v585_v2  ;;  %v419_v2 = vld [vmem:[%s1303_s5 + $0x128] sm:$0xff] }
  0x36   :  { %225 = vmatpush.msrb.mxu0 %v202_v17  ;;  %270 = vmatpush.msrb.mxu1 %v568_v33  ;;  %v577_v17 = vld [vmem:[%s1301_s3 + $0x100] sm:$0xff] }
  0x37   :  { %318 = vmatpush.msrb.mxu2 %v584_v3  ;;  %v420_v3 = vld [vmem:[%s1303_s5 + $0x130] sm:$0xff] }
  0x38   :  { %226 = vmatpush.msrb.mxu0 %v201_v18  ;;  %271 = vmatpush.msrb.mxu1 %v567_v36  ;;  %v609_v18 = vld [vmem:[%s1301_s3 + $0x1f8] sm:$0xff] }
  0x39   :  { %319 = vmatpush.msrb.mxu2 %v583_v5  ;;  %357 = vmatpush.msrb.mxu3 %v609_v18  ;;  %v414_v5 = vld [vmem:[%s1303_s5 + $0x100] sm:$0xff] }
  0x3a   :  { %227 = vmatpush.msrb.mxu0 %v200_v19  ;;  %272 = vmatpush.msrb.mxu1 %v566_v38  ;;  %v608_v19 = vld [vmem:[%s1301_s3 + $0x1f0] sm:$0xff]  ;;  %v402_v18 = vld [vmem:[%s1303_s5 + $0xa0] sm:$0xff] }
  0x3b   :  { %320 = vmatpush.msrb.mxu2 %v582_v6  ;;  %358 = vmatpush.msrb.mxu3 %v608_v19  ;;  %v596_v38 = vld [vmem:[%s1301_s3 + $0x190] sm:$0xff]  ;;  %v415_v6 = vld [vmem:[%s1303_s5 + $0x108] sm:$0xff] }
  0x3c   :  { %228 = vmatpush.msrb.mxu0 %v199_v20  ;;  %273 = vmatpush.msrb.mxu1 %v565_v42  ;;  %v607_v20 = vld [vmem:[%s1301_s3 + $0x1e8] sm:$0xff] }
  0x3d   :  { %321 = vmatpush.msrb.mxu2 %v581_v9  ;;  %359 = vmatpush.msrb.mxu3 %v607_v20  ;;  %v443_v42 = vld [vmem:[%s1303_s5 + $0x1e8] sm:$0xff]  ;;  %v410_v9 = vld [vmem:[%s1303_s5 + $0xe0] sm:$0xff] }
  0x3e   :  { %229 = vmatpush.msrb.mxu0 %v198_v21  ;;  %274 = vmatpush.msrb.mxu1 %v564_v45  ;;  %v606_v21 = vld [vmem:[%s1301_s3 + $0x1e0] sm:$0xff]  ;;  %v403_v19 = vld [vmem:[%s1303_s5 + $0xa8] sm:$0xff] }
  0x3f   :  { %322 = vmatpush.msrb.mxu2 %v580_v11  ;;  %360 = vmatpush.msrb.mxu3 %v606_v21  ;;  %v438_v45 = vld [vmem:[%s1303_s5 + $0x1c0] sm:$0xff]  ;;  %v412_v11 = vld [vmem:[%s1303_s5 + $0xf0] sm:$0xff] }
  0x40   :  { %230 = vmatpush.msrb.mxu0 %v197_v22  ;;  %275 = vmatpush.msrb.mxu1 %v563_v49  ;;  %v605_v22 = vld [vmem:[%s1301_s3 + $0x1d8] sm:$0xff]  ;;  %v434_v49 = vld [vmem:[%s1303_s5 + $0x1a0] sm:$0xff]  ;;  %v404_v21 = vld [vmem:[%s1303_s5 + $0xb0] sm:$0xff] }
  0x41   :  { %323 = vmatpush.msrb.mxu2 %v579_v15  ;;  %361 = vmatpush.msrb.mxu3 %v605_v22  ;;  %v407_v15 = vld [vmem:[%s1303_s5 + $0xc8] sm:$0xff]  ;;  %v405_v22 = vld [vmem:[%s1303_s5 + $0xb8] sm:$0xff] }
  0x42   :  { %231 = vmatpush.msrb.mxu0 %v196_v23  ;;  %276 = vmatpush.msrb.mxu1 %v562_v56  ;;  %v604_v23 = vld [vmem:[%s1301_s3 + $0x1d0] sm:$0xff]  ;;  %v433_v56 = vld [vmem:[%s1303_s5 + $0x198] sm:$0xff] }
  0x43   :  { %324 = vmatpush.msrb.mxu2 %v578_v16  ;;  %362 = vmatpush.msrb.mxu3 %v604_v23  ;;  %v408_v16 = vld [vmem:[%s1303_s5 + $0xd0] sm:$0xff] }
  0x44   :  { %277 = vmatpush.msrb.mxu1 %v561_v57  ;;  %v426_v57 = vld [vmem:[%s1303_s5 + $0x160] sm:$0xff] }
  0x45   :  { %325 = vmatpush.msrb.mxu2 %v577_v17  ;;  %363 = vmatpush.msrb.mxu3 %v603_v24  ;;  %v409_v17 = vld [vmem:[%s1303_s5 + $0xd8] sm:$0xff]  ;;  %v398_v24 = vld [vmem:[%s1303_s5 + $0x80] sm:$0xff] }
  0x46   :  { %278 = vmatpush.msrb.mxu1 %v560_v58  ;;  %v427_v58 = vld [vmem:[%s1303_s5 + $0x168] sm:$0xff] }
  0x47   :  { %364 = vmatpush.msrb.mxu3 %v602_v25  ;;  %v399_v25 = vld [vmem:[%s1303_s5 + $0x88] sm:$0xff] }
  0x48   :  { %479 = vmatpush.msra.mxu1 %v443_v42  ;;  %v388_v42 = vld [vmem:[%s1303_s5 + $0x30] sm:$0xff] }
  0x49   :  { %365 = vmatpush.msrb.mxu3 %v601_v26  ;;  %v400_v26 = vld [vmem:[%s1303_s5 + $0x90] sm:$0xff] }
  0x4b   :  { %366 = vmatpush.msrb.mxu3 %v600_v28  ;;  %v401_v28 = vld [vmem:[%s1303_s5 + $0x98] sm:$0xff] }
  0x4d   :  { %367 = vmatpush.msrb.mxu3 %v599_v29  ;;  %v394_v29 = vld [vmem:[%s1303_s5 + $0x60] sm:$0xff] }
  0xa0   :  { %v119_v32 = vpop.f32.mrf.mxu0 }
  0xa1   :  { %v120_v34 = vadd.f32 %v611_v30, %v119_v32  ;;  %v598_v32 = vld [vmem:[%s1301_s3 + $0x1a0] sm:$0xff] }
  0xa2   :  { %v142_v35 = vpop.f32.mrf.mxu1  ;;  %368 = vmatpush.msrb.mxu3 %v598_v32  ;;  %v397_v32 = vld [vmem:[%s1303_s5 + $0x78] sm:$0xff] }
  0xa3   :  { %v143_v37 = vadd.f32 %v142_v35, %v120_v34  ;;  %v597_v34 = vld [vmem:[%s1301_s3 + $0x198] sm:$0xff] }
  0xa4   :  { %369 = vmatpush.msrb.mxu3 %v597_v34 }
  0xa5   :  { %v165_v39 = vpop.f32.mrf.mxu2 }
  0xa6   :  { %v166_v40 = vadd.f32 %v165_v39, %v143_v37  ;;  %v188_v41 = vpop.f32.mrf.mxu3  ;;  %370 = vmatpush.msrb.mxu3 %v596_v38  ;;  %v595_v39 = vld [vmem:[%s1301_s3 + $0x188] sm:$0xff]  ;;  %v392_v38 = vld [vmem:[%s1303_s5 + $0x50] sm:$0xff] }
  0xa8   :  { %v189_v43 = vadd.f32 %v188_v41, %v166_v40  ;;  %v122_v44 = vpop.f32.mrf.mxu0  ;;  %371 = vmatpush.msrb.mxu3 %v595_v39  ;;  %v594_v40 = vld [vmem:[%s1301_s3 + $0x180] sm:$0xff]  ;;  %v393_v39 = vld [vmem:[%s1303_s5 + $0x58] sm:$0xff] }
  0xa9   :  { %v123_v46 = vadd.f32 %v611_v30, %v122_v44  ;;  %v442_v41 = vld [vmem:[%s1303_s5 + $0x1e0] sm:$0xff]  ;;  %v445_v44 = vld [vmem:[%s1303_s5 + $0x1f8] sm:$0xff] }
  0xaa   :  { %v194_v47 = vmax.f32 %v189_v43, 0.0  ;;  %v145_v48 = vpop.f32.mrf.mxu1  ;;  %372 = vmatpush.msrb.mxu3 %v594_v40  ;;  %v444_v43 = vld [vmem:[%s1303_s5 + $0x1f0] sm:$0xff]  ;;  %456 = vmatpush.msra.mxu0 %v442_v41  ;;  %v386_v40 = vld [vmem:[%s1303_s5 + $0x20] sm:$0xff]  ;;  %v387_v41 = vld [vmem:[%s1303_s5 + $0x28] sm:$0xff] }
  0xab   :  { %v146_v50 = vadd.f32 %v145_v48, %v123_v46  ;;  %v439_v46 = vld [vmem:[%s1303_s5 + $0x1c8] sm:$0xff]  ;;  %502 = vmatpush.msra.mxu2 %v444_v43  ;;  %v441_v48 = vld [vmem:[%s1303_s5 + $0x1d8] sm:$0xff] }
  0xac   :  { %232 = vmatmul.f32.vlgmr.msrb.gmra.mxu0 %v194_v47  ;;  %525 = vmatpush.msra.mxu3 %v445_v44  ;;  %v440_v47 = vld [vmem:[%s1303_s5 + $0x1d0] sm:$0xff]  ;;  %v389_v43 = vld [vmem:[%s1303_s5 + $0x38] sm:$0xff]  ;;  %v382_v44 = vld [vmem:[%s1303_s5] sm:$0xff] }
  0xad   :  { %v168_v51 = vpop.f32.mrf.mxu2  ;;  %457 = vmatpush.msra.mxu0 %v438_v45  ;;  %480 = vmatpush.msra.mxu1 %v439_v46  ;;  %v383_v45 = vld [vmem:[%s1303_s5 + $0x8] sm:$0xff]  ;;  %v384_v46 = vld [vmem:[%s1303_s5 + $0x10] sm:$0xff] }
  0xae   :  { %v169_v52 = vadd.f32 %v168_v51, %v146_v50  ;;  %v191_v53 = vpop.f32.mrf.mxu3  ;;  %v435_v50 = vld [vmem:[%s1303_s5 + $0x1a8] sm:$0xff]  ;;  %v436_v51 = vld [vmem:[%s1303_s5 + $0x1b0] sm:$0xff]  ;;  %503 = vmatpush.msra.mxu2 %v440_v47  ;;  %526 = vmatpush.msra.mxu3 %v441_v48  ;;  %v385_v47 = vld [vmem:[%s1303_s5 + $0x18] sm:$0xff] }
  0xaf   :  { %458 = vmatpush.msra.mxu0 %v434_v49  ;;  %481 = vmatpush.msra.mxu1 %v435_v50  ;;  %v615_v48 = vld [vmem:[%s1302_s4 + $0x3] ss:$0 sm:$0xff] }
  0xb0   :  { %v192_v54 = vadd.f32 %v191_v53, %v169_v52  ;;  %v437_v52 = vld [vmem:[%s1303_s5 + $0x1b8] sm:$0xff]  ;;  %v430_v53 = vld [vmem:[%s1303_s5 + $0x180] sm:$0xff]  ;;  %504 = vmatpush.msra.mxu2 %v436_v51 }
  0xb1   :  { %527 = vmatpush.msra.mxu3 %v437_v52  ;;  %459 = vmatpush.msra.mxu0 %v430_v53 }
  0xb2   :  { %v195_v55 = vmax.f32 %v192_v54, 0.0  ;;  %v431_v54 = vld [vmem:[%s1303_s5 + $0x188] sm:$0xff] }
  0xb3   :  { %482 = vmatpush.msra.mxu1 %v431_v54  ;;  %528 = vmatpush.msra.mxu3 %v433_v56 }
  0xb4   :  { %235 = vmatmul.f32.gmra.mxu0 %v195_v55  ;;  %v432_v55 = vld [vmem:[%s1303_s5 + $0x190] sm:$0xff] }
  0xb5   :  { %505 = vmatpush.msra.mxu2 %v432_v55  ;;  %460 = vmatpush.msra.mxu0 %v426_v57  ;;  %v446_v55 = vld [vmem:[%s1304_s6] sm:$0xf] }
  0xb6   :  { %483 = vmatpush.msra.mxu1 %v427_v58  ;;  %529 = vmatpush.msra.mxu3 %v429_v60  ;;  %v448_v56 = vperm.slane %v446_v55, 0  ;;  %v449_v57 = vperm.slane %v446_v55, 1 }
  0xb7   :  { %506 = vmatpush.msra.mxu2 %v428_v59  ;;  %461 = vmatpush.msra.mxu0 %v422_v61 }
  0xb8   :  { %484 = vmatpush.msra.mxu1 %v423_v62  ;;  %530 = vmatpush.msra.mxu3 %v425_v0  ;;  %v450_v62 = vperm.slane %v446_v55, 2 }
  0xb9   :  { %507 = vmatpush.msra.mxu2 %v424_v63  ;;  %462 = vmatpush.msra.mxu0 %v418_v1  ;;  %v451_v63 = vperm.slane %v446_v55, 3 }
  0xba   :  { %485 = vmatpush.msra.mxu1 %v419_v2 }
  0xbb   :  { %508 = vmatpush.msra.mxu2 %v420_v3  ;;  %463 = vmatpush.msra.mxu0 %v414_v5 }
  0xbc   :  { %486 = vmatpush.msra.mxu1 %v415_v6 }
  0xbd   :  { %464 = vmatpush.msra.mxu0 %v410_v9 }
 0x129   :  { %v233_v7 = vpop.f32.mrf.mxu0 }
 0x12a   :  { %v234_v8 = vadd.f32 %v612_v4, %v233_v7  ;;  %v416_v7 = vld [vmem:[%s1303_s5 + $0x110] sm:$0xff] }
 0x12b   :  { %509 = vmatpush.msra.mxu2 %v416_v7 }
 0x12c   :  { %v239_v10 = vmax.f32 %v234_v8, 0.0  ;;  %v417_v8 = vld [vmem:[%s1303_s5 + $0x118] sm:$0xff] }
 0x12d   :  { %510 = vmatpush.msra.mxu2 %v412_v11 }
 0x12e   :  { %279 = vmatmul.f32.vlgmr.msrb.gmra.mxu1 %v239_v10  ;;  %v411_v10 = vld [vmem:[%s1303_s5 + $0xe8] sm:$0xff] }
 0x12f   :  { %487 = vmatpush.msra.mxu1 %v411_v10  ;;  %511 = vmatpush.msra.mxu2 %v408_v16 }
 0x131   :  { %v236_v12 = vpop.f32.mrf.mxu0  ;;  %488 = vmatpush.msra.mxu1 %v407_v15  ;;  %512 = vmatpush.msra.mxu2 %v404_v21 }
 0x132   :  { %v237_v13 = vadd.f32 %v612_v4, %v236_v12  ;;  %v421_v4 = vld [vmem:[%s1303_s5 + $0x138] sm:$0xff] }
 0x133   :  { %531 = vmatpush.msra.mxu3 %v421_v4  ;;  %v413_v12 = vld [vmem:[%s1303_s5 + $0xf8] sm:$0xff]  ;;  %489 = vmatpush.msra.mxu1 %v403_v19 }
 0x134   :  { %v240_v14 = vmax.f32 %v237_v13, 0.0  ;;  %v614_v13 = vld [vmem:[%s1302_s4 + $0x2] ss:$0 sm:$0xff]  ;;  %513 = vmatpush.msra.mxu2 %v400_v26 }
 0x135   :  { %532 = vmatpush.msra.mxu3 %v417_v8  ;;  %490 = vmatpush.msra.mxu1 %v399_v25 }
 0x136   :  { %282 = vmatmul.f32.gmra.mxu1 %v240_v14  ;;  %v406_v14 = vld [vmem:[%s1303_s5 + $0xc0] sm:$0xff] }
 0x137   :  { %533 = vmatpush.msra.mxu3 %v413_v12  ;;  %465 = vmatpush.msra.mxu0 %v406_v14 }
 0x139   :  { %534 = vmatpush.msra.mxu3 %v409_v17  ;;  %466 = vmatpush.msra.mxu0 %v402_v18 }
 0x13b   :  { %535 = vmatpush.msra.mxu3 %v405_v22  ;;  %467 = vmatpush.msra.mxu0 %v398_v24 }
 0x13d   :  { %536 = vmatpush.msra.mxu3 %v401_v28  ;;  %468 = vmatpush.msra.mxu0 %v394_v29 }
 0x13f   :  { %537 = vmatpush.msra.mxu3 %v397_v32 }
 0x141   :  { %538 = vmatpush.msra.mxu3 %v393_v39 }
 0x143   :  { %539 = vmatpush.msra.mxu3 %v389_v43 }
 0x145   :  { %540 = vmatpush.msra.mxu3 %v385_v47 }
 0x1ab   :  { %v280_v30 = vpop.f32.mrf.mxu1 }
 0x1ac   :  { %v281_v31 = vadd.f32 %v613_v27, %v280_v30  ;;  %v395_v30 = vld [vmem:[%s1303_s5 + $0x68] sm:$0xff] }
 0x1ad   :  { %491 = vmatpush.msra.mxu1 %v395_v30 }
 0x1ae   :  { %v286_v33 = vmax.f32 %v281_v31, 0.0  ;;  %v396_v31 = vld [vmem:[%s1303_s5 + $0x70] sm:$0xff] }
 0x1af   :  { %514 = vmatpush.msra.mxu2 %v396_v31 }
 0x1b0   :  { %326 = vmatmul.f32.vlgmr.msrb.gmra.mxu2 %v286_v33 }
 0x1b1   :  { %515 = vmatpush.msra.mxu2 %v392_v38 }
 0x1b3   :  { %v283_v35 = vpop.f32.mrf.mxu1  ;;  %516 = vmatpush.msra.mxu2 %v388_v42 }
 0x1b4   :  { %v284_v36 = vadd.f32 %v613_v27, %v283_v35 }
 0x1b5   :  { %517 = vmatpush.msra.mxu2 %v384_v46 }
 0x1b6   :  { %v287_v37 = vmax.f32 %v284_v36, 0.0  ;;  %v390_v36 = vld [vmem:[%s1303_s5 + $0x40] sm:$0xff] }
 0x1b7   :  { %469 = vmatpush.msra.mxu0 %v390_v36 }
 0x1b8   :  { %329 = vmatmul.f32.gmra.mxu2 %v287_v37  ;;  %v391_v37 = vld [vmem:[%s1303_s5 + $0x48] sm:$0xff] }
 0x1b9   :  { %492 = vmatpush.msra.mxu1 %v391_v37  ;;  %470 = vmatpush.msra.mxu0 %v386_v40 }
 0x1bb   :  { %493 = vmatpush.msra.mxu1 %v387_v41  ;;  %471 = vmatpush.msra.mxu0 %v382_v44 }
 0x1bd   :  { %494 = vmatpush.msra.mxu1 %v383_v45 }
 0x233   :  { %v327_v20 = vpop.f32.mrf.mxu2 }
 0x234   :  { %v328_v23 = vadd.f32 %v614_v13, %v327_v20 }
 0x236   :  { %v333_v27 = vmax.f32 %v328_v23, 0.0 }
 0x238   :  { %373 = vmatmul.f32.vlgmr.msrb.gmra.mxu3 %v333_v27 }
 0x23b   :  { %v330_v33 = vpop.f32.mrf.mxu2 }
 0x23c   :  { %v331_v34 = vadd.f32 %v614_v13, %v330_v33 }
 0x23e   :  { %v334_v35 = vmax.f32 %v331_v34, 0.0 }
 0x240   :  { %376 = vmatmul.f32.gmra.mxu3 %v334_v35 }
 0x2bb   :  { %v374_v49 = vpop.f32.mrf.mxu3 }
 0x2bc   :  { %v375_v50 = vadd.f32 %v615_v48, %v374_v49 }
 0x2be   :  { %v380_v51 = vmax.f32 %v375_v50, 0.0 }
 0x2c0   :  { %472 = vmatmul.f32.vlgmr.msra.gmra.mxu0 %v380_v51  ;;  %495 = vmatmul.f32.vlgmr.msra.gmra.mxu1 %v380_v51 }
 0x2c1   :  { %518 = vmatmul.f32.vlgmr.msra.gmra.mxu2 %v380_v51  ;;  %541 = vmatmul.f32.vlgmr.msra.gmra.mxu3 %v380_v51 }
 0x2c3   :  { %v377_v52 = vpop.f32.mrf.mxu3 }
 0x2c4   :  { %v378_v53 = vadd.f32 %v615_v48, %v377_v52 }
 0x2c6   :  { %v381_v54 = vmax.f32 %v378_v53, 0.0 }
 0x2c8   :  { %475 = vmatmul.f32.gmra.mxu0 %v381_v54  ;;  %498 = vmatmul.f32.gmra.mxu1 %v381_v54 }
 0x2c9   :  { %521 = vmatmul.f32.gmra.mxu2 %v381_v54  ;;  %544 = vmatmul.f32.gmra.mxu3 %v381_v54 }
 0x33d   :  { %v473_v58 = vpop.f32.mrf.mxu0  ;;  %v496_v59 = vpop.f32.mrf.mxu1 }
 0x33e   :  { %v474_v60 = vadd.f32 %v473_v58, %v448_v56  ;;  %v497_v61 = vadd.f32 %v496_v59, %v449_v57 }
 0x340   :  { %548 = vst [vmem:[%s1305_s7] sm:$0xff] %v474_v60 }
 0x341   :  { %549 = vst [vmem:[%s1305_s7 + $0x8] sm:$0xff] %v497_v61 }
 0x344   :  { %v519_v0 = vpop.f32.mrf.mxu2  ;;  %v542_v1 = vpop.f32.mrf.mxu3 }
 0x345   :  { %v520_v2 = vadd.f32 %v519_v0, %v450_v62  ;;  %v543_v3 = vadd.f32 %v542_v1, %v451_v63  ;;  %v476_v4 = vpop.f32.mrf.mxu0  ;;  %v499_v5 = vpop.f32.mrf.mxu1 }
 0x346   :  { %v477_v6 = vadd.f32 %v476_v4, %v448_v56  ;;  %v500_v7 = vadd.f32 %v499_v5, %v449_v57 }
 0x347   :  { %550 = vst [vmem:[%s1305_s7 + $0x10] sm:$0xff] %v520_v2 }
 0x348   :  { %551 = vst [vmem:[%s1305_s7 + $0x18] sm:$0xff] %v543_v3 }
 0x349   :  { %552 = vst [vmem:[%s1305_s7 + $0x20] sm:$0xff] %v477_v6 }
 0x34a   :  { %553 = vst [vmem:[%s1305_s7 + $0x28] sm:$0xff] %v500_v7 }
 0x34c   :  { %v522_v8 = vpop.f32.mrf.mxu2  ;;  %v545_v9 = vpop.f32.mrf.mxu3 }
 0x34d   :  { %v523_v10 = vadd.f32 %v522_v8, %v450_v62  ;;  %v546_v11 = vadd.f32 %v545_v9, %v451_v63 }
 0x34f   :  { %554 = vst [vmem:[%s1305_s7 + $0x30] sm:$0xff] %v523_v10 }
 0x350   :  { %555 = vst [vmem:[%s1305_s7 + $0x38] sm:$0xff] %v546_v11 }

</bundles_post_ra>
